<compile_context>
chip_gen: v5e
topology: v5e:2x2
jax: 0.10.0
libtpu: 0.0.40
codegen_flags: <defaults>
</compile_context>

<pallas_src>
import functools

import jax
import jax.numpy as jnp
from jax.experimental import pallas as pl
from jax.experimental.pallas import tpu as pltpu


def _round_up(x, m):
    return ((x + m - 1) // m) * m


# ----------------------------------------------------------------------------
# Fused decoder-step kernel.
# ----------------------------------------------------------------------------
def _decoder_step_kernel(tok_ref, h_ref, enc_ref, emb_ref,
                         wah_ref, wae_ref, ba_ref, v_ref,
                         wie_ref, wiw_ref, bi_ref, whh_ref, bhh_ref,
                         woh_ref, wow_ref, woe_ref, bo_ref,
                         pred_ref, hout_ref, a_ref, *, dh):
    n_b = h_ref.shape[0]
    vocab = emb_ref.shape[0]

    # ---- embedding lookup as a one-hot MXU matmul (Dropout = identity, eval)
    tok = tok_ref[...]                                            # (N, 1) int32
    onehot = (jax.lax.broadcasted_iota(jnp.int32, (n_b, vocab), 1)
              == tok).astype(jnp.float32)                         # (N, V)
    embedded = jnp.dot(onehot, emb_ref[...],
                       preferred_element_type=jnp.float32)        # (N, E)

    h = h_ref[...]                                                # (N, Dh)
    enc = enc_ref[...]                                            # (N, S, 2He)
    s_len = enc.shape[1]
    e2 = enc.shape[2]

    # ---- additive (Bahdanau) attention:
    #      energy = tanh([h ; enc] @ W_attn + b) ;  a = softmax_s(v . energy)
    hid_proj = jnp.dot(h, wah_ref[...],
                       preferred_element_type=jnp.float32)        # (N, Dh)
    enc_proj = jnp.dot(enc.reshape(n_b * s_len, e2), wae_ref[...],
                       preferred_element_type=jnp.float32
                       ).reshape(n_b, s_len, dh)                  # (N, S, Dh)
    energy = jnp.tanh(hid_proj[:, None, :] + enc_proj + ba_ref[...])
    scores = jnp.sum(energy * v_ref[...], axis=-1)                # (N, S)
    scores = scores - jnp.max(scores, axis=-1, keepdims=True)
    ex = jnp.exp(scores)
    att = ex / jnp.sum(ex, axis=-1, keepdims=True)                # softmax over S
    a_ref[...] = att

    # ---- weighted context (the torch.bmm)
    weighted = jnp.sum(att[:, :, None] * enc, axis=1)             # (N, 2He)

    # ---- GRU cell on rnn_input = [embedded ; weighted]; gate order (r, z, n)
    gx = (jnp.dot(embedded, wie_ref[...], preferred_element_type=jnp.float32)
          + jnp.dot(weighted, wiw_ref[...], preferred_element_type=jnp.float32)
          + bi_ref[...])                                          # (N, 3Dh)
    gh = (jnp.dot(h, whh_ref[...], preferred_element_type=jnp.float32)
          + bhh_ref[...])                                         # (N, 3Dh)
    r = jax.nn.sigmoid(gx[:, :dh] + gh[:, :dh])
    z = jax.nn.sigmoid(gx[:, dh:2 * dh] + gh[:, dh:2 * dh])
    n = jnp.tanh(gx[:, 2 * dh:] + r * gh[:, 2 * dh:])
    h_new = (1.0 - z) * n + z * h                                 # == GRU output
    hout_ref[...] = h_new

    # ---- fc_out on [output ; weighted ; embedded] (128-lane padded logits)
    pred = (jnp.dot(h_new, woh_ref[...], preferred_element_type=jnp.float32)
            + jnp.dot(weighted, wow_ref[...], preferred_element_type=jnp.float32)
            + jnp.dot(embedded, woe_ref[...], preferred_element_type=jnp.float32)
            + bo_ref[...])
    pred_ref[...] = pred


def _full_spec(shape):
    nd = len(shape)
    return pl.BlockSpec(tuple(shape), lambda i, _nd=nd: (0,) * _nd)


def decoder_forward(params, tokens, hidden, encoder_outputs):
    """tokens:(N,) int, hidden:(N,Dh), encoder_outputs:(S,N,2He)
       -> (prediction (N,V), new hidden (N,Dh), attention (N,S))."""
    s_len, n_b, _ = encoder_outputs.shape
    dh = hidden.shape[1]
    vocab = params["output_dim"]
    vpad = params["Woh"].shape[1]

    # layout glue: batch-first encoder outputs; 2-D int token column
    enc_bf = jnp.transpose(encoder_outputs, (1, 0, 2)).astype(jnp.float32)
    tok2d = tokens.reshape(n_b, 1).astype(jnp.int32)

    args = (tok2d, hidden.astype(jnp.float32), enc_bf, params["emb"],
            params["Wah"], params["Wae"], params["ba"], params["v"],
            params["Wie"], params["Wiw"], params["bi"],
            params["Whh"], params["bhh"],
            params["Woh"], params["Wow"], params["Woe"], params["bo"])

    out_shapes = (jax.ShapeDtypeStruct((n_b, vpad), jnp.float32),
                  jax.ShapeDtypeStruct((n_b, dh), jnp.float32),
                  jax.ShapeDtypeStruct((n_b, s_len), jnp.float32))

    pred_p, h_new, att = pl.pallas_call(
        functools.partial(_decoder_step_kernel, dh=dh),
        out_shape=out_shapes,
        grid=(1,),
        in_specs=[_full_spec(a.shape) for a in args],
        out_specs=tuple(_full_spec(o.shape) for o in out_shapes),
        compiler_params=pltpu.CompilerParams(
            dimension_semantics=("arbitrary",)),
    )(*args)

    return pred_p[:, :vocab], h_new, att


# ----------------------------------------------------------------------------
# Pure-JAX reference of the same forward math (for numerical validation).
# ----------------------------------------------------------------------------
def decoder_forward_ref(params, tokens, hidden, encoder_outputs):
    vocab = params["output_dim"]
    dh = hidden.shape[1]
    emb = params["emb"][tokens]                                   # (N, E)
    enc = jnp.transpose(encoder_outputs, (1, 0, 2))               # (N, S, 2He)

    hid_proj = hidden @ params["Wah"]
    enc_proj = jnp.einsum("nse,ed->nsd", enc, params["Wae"])
    energy = jnp.tanh(hid_proj[:, None, :] + enc_proj + params["ba"])
    scores = jnp.sum(energy * params["v"], axis=-1)
    att = jax.nn.softmax(scores, axis=-1)
    weighted = jnp.einsum("ns,nse->ne", att, enc)

    gx = emb @ params["Wie"] + weighted @ params["Wiw"] + params["bi"]
    gh = hidden @ params["Whh"] + params["bhh"]
    r = jax.nn.sigmoid(gx[:, :dh] + gh[:, :dh])
    z = jax.nn.sigmoid(gx[:, dh:2 * dh] + gh[:, dh:2 * dh])
    n = jnp.tanh(gx[:, 2 * dh:] + r * gh[:, 2 * dh:])
    h_new = (1.0 - z) * n + z * hidden

    pred = (h_new @ params["Woh"] + weighted @ params["Wow"]
            + emb @ params["Woe"] + params["bo"])[:, :vocab]
    return pred, h_new, att


# ----------------------------------------------------------------------------
# Deterministic parameter construction (shapes follow the PyTorch __init__).
# ----------------------------------------------------------------------------
def init_params(key, output_dim=48, emb_dim=32, enc_hid_dim=32, dec_hid_dim=32):
    ks = iter(jax.random.split(key, 32))
    nk = lambda: next(ks)
    s = lambda *shape: 0.1 * jax.random.normal(nk(), shape, jnp.float32)

    e2 = 2 * enc_hid_dim
    dh = dec_hid_dim
    vpad = _round_up(max(output_dim, 128), 128)       # lane-dense logits store

    def pad_cols(w):
        return (jnp.zeros(w.shape[:-1] + (vpad,), jnp.float32)
                .at[..., :output_dim].set(w))

    return {
        "output_dim": output_dim,
        # nn.Embedding(output_dim, emb_dim)
        "emb": s(output_dim, emb_dim),
        # attention: nn.Linear(2He+Dh -> Dh) split over the [hidden ; enc] concat,
        # plus v: nn.Linear(Dh -> 1, bias=False)
        "Wah": s(dh, dh), "Wae": s(e2, dh), "ba": s(1, dh), "v": s(1, dh),
        # nn.GRU(2He+E, Dh): input weights split over [embedded ; weighted],
        # gate order (r, z, n) as in PyTorch
        "Wie": s(emb_dim, 3 * dh), "Wiw": s(e2, 3 * dh), "bi": s(1, 3 * dh),
        "Whh": s(dh, 3 * dh), "bhh": s(1, 3 * dh),
        # fc_out: nn.Linear(Dh+2He+E -> V), columns zero-padded to 128 lanes
        "Woh": pad_cols(s(dh, output_dim)),
        "Wow": pad_cols(s(e2, output_dim)),
        "Woe": pad_cols(s(emb_dim, output_dim)),
        "bo": pad_cols(s(1, output_dim)),
    }


# ----------------------------------------------------------------------------
if __name__ == "__main__":
    key = jax.random.PRNGKey(0)
    k_par, k_tok, k_hid, k_enc = jax.random.split(key, 4)

    N, S = 8, 16                          # batch, src_len
    OUTPUT_DIM, EMB_DIM, ENC_HID, DEC_HID = 48, 32, 32, 32

    params = init_params(k_par, OUTPUT_DIM, EMB_DIM, ENC_HID, DEC_HID)
    tokens = jax.random.randint(k_tok, (N,), 0, OUTPUT_DIM)
    hidden = jax.random.normal(k_hid, (N, DEC_HID), jnp.float32)
    encoder_outputs = jax.random.normal(k_enc, (S, N, 2 * ENC_HID), jnp.float32)

    pred, h_new, att = decoder_forward(params, tokens, hidden, encoder_outputs)
    pred, h_new, att = jax.block_until_ready((pred, h_new, att))

    assert pred.shape == (N, OUTPUT_DIM), pred.shape
    assert h_new.shape == (N, DEC_HID), h_new.shape
    assert att.shape == (N, S), att.shape
    assert bool(jnp.all(jnp.isfinite(pred)))
    assert bool(jnp.all(jnp.isfinite(h_new)))
    assert bool(jnp.allclose(jnp.sum(att, axis=-1), 1.0, atol=1e-4))

    # numerical check against the pure-JAX reference of the same forward
    pred_r, h_r, a_r = decoder_forward_ref(params, tokens, hidden,
                                           encoder_outputs)
    assert bool(jnp.allclose(pred, pred_r, atol=5e-3, rtol=5e-3))
    assert bool(jnp.allclose(h_new, h_r, atol=5e-3, rtol=5e-3))
    assert bool(jnp.allclose(att, a_r, atol=5e-3, rtol=5e-3))

    print("KERNEL_OK")
</pallas_src>

<mosaic_0001>
module attributes {stable_mosaic.version = 11 : i64} {
  func.func @_decoder_step_kernel(%arg0: i32, %arg1: memref<8x1xi32, #tpu.memory_space<vmem>>, %arg2: memref<8x32xf32, #tpu.memory_space<vmem>>, %arg3: memref<8x16x64xf32, #tpu.memory_space<vmem>>, %arg4: memref<48x32xf32, #tpu.memory_space<vmem>>, %arg5: memref<32x32xf32, #tpu.memory_space<vmem>>, %arg6: memref<64x32xf32, #tpu.memory_space<vmem>>, %arg7: memref<1x32xf32, #tpu.memory_space<vmem>>, %arg8: memref<1x32xf32, #tpu.memory_space<vmem>>, %arg9: memref<32x96xf32, #tpu.memory_space<vmem>>, %arg10: memref<64x96xf32, #tpu.memory_space<vmem>>, %arg11: memref<1x96xf32, #tpu.memory_space<vmem>>, %arg12: memref<32x96xf32, #tpu.memory_space<vmem>>, %arg13: memref<1x96xf32, #tpu.memory_space<vmem>>, %arg14: memref<32x128xf32, #tpu.memory_space<vmem>>, %arg15: memref<64x128xf32, #tpu.memory_space<vmem>>, %arg16: memref<32x128xf32, #tpu.memory_space<vmem>>, %arg17: memref<1x128xf32, #tpu.memory_space<vmem>>, %arg18: memref<8x128xf32, #tpu.memory_space<vmem>>, %arg19: memref<8x32xf32, #tpu.memory_space<vmem>>, %arg20: memref<8x16xf32, #tpu.memory_space<vmem>>) attributes {dimension_semantics = [#tpu.dimension_semantics<arbitrary>], iteration_bounds = array<i64: 1>, scalar_prefetch = 0 : i64, scratch_operands = 0 : i64, tpu.core_type = #tpu.core_type<tc>, window_params = [{pipeline_mode = #tpu.pipeline_mode<synchronous>, transform_indices = @transform_0, window_bounds = array<i64: 8, 1>}, {pipeline_mode = #tpu.pipeline_mode<synchronous>, transform_indices = @transform_1, window_bounds = array<i64: 8, 32>}, {pipeline_mode = #tpu.pipeline_mode<synchronous>, transform_indices = @transform_2, window_bounds = array<i64: 8, 16, 64>}, {pipeline_mode = #tpu.pipeline_mode<synchronous>, transform_indices = @transform_3, window_bounds = array<i64: 48, 32>}, {pipeline_mode = #tpu.pipeline_mode<synchronous>, transform_indices = @transform_4, window_bounds = array<i64: 32, 32>}, {pipeline_mode = #tpu.pipeline_mode<synchronous>, transform_indices = @transform_5, window_bounds = array<i64: 64, 32>}, {pipeline_mode = #tpu.pipeline_mode<synchronous>, transform_indices = @transform_6, window_bounds = array<i64: 1, 32>}, {pipeline_mode = #tpu.pipeline_mode<synchronous>, transform_indices = @transform_7, window_bounds = array<i64: 1, 32>}, {pipeline_mode = #tpu.pipeline_mode<synchronous>, transform_indices = @transform_8, window_bounds = array<i64: 32, 96>}, {pipeline_mode = #tpu.pipeline_mode<synchronous>, transform_indices = @transform_9, window_bounds = array<i64: 64, 96>}, {pipeline_mode = #tpu.pipeline_mode<synchronous>, transform_indices = @transform_10, window_bounds = array<i64: 1, 96>}, {pipeline_mode = #tpu.pipeline_mode<synchronous>, transform_indices = @transform_11, window_bounds = array<i64: 32, 96>}, {pipeline_mode = #tpu.pipeline_mode<synchronous>, transform_indices = @transform_12, window_bounds = array<i64: 1, 96>}, {pipeline_mode = #tpu.pipeline_mode<synchronous>, transform_indices = @transform_13, window_bounds = array<i64: 32, 128>}, {pipeline_mode = #tpu.pipeline_mode<synchronous>, transform_indices = @transform_14, window_bounds = array<i64: 64, 128>}, {pipeline_mode = #tpu.pipeline_mode<synchronous>, transform_indices = @transform_15, window_bounds = array<i64: 32, 128>}, {pipeline_mode = #tpu.pipeline_mode<synchronous>, transform_indices = @transform_16, window_bounds = array<i64: 1, 128>}, {pipeline_mode = #tpu.pipeline_mode<synchronous>, transform_indices = @transform_17, window_bounds = array<i64: 8, 128>}, {pipeline_mode = #tpu.pipeline_mode<synchronous>, transform_indices = @transform_18, window_bounds = array<i64: 8, 32>}, {pipeline_mode = #tpu.pipeline_mode<synchronous>, transform_indices = @transform_19, window_bounds = array<i64: 8, 16>}]} {
    %c0 = arith.constant 0 : index
    %c0_0 = arith.constant 0 : index
    %0 = vector.load %arg1[%c0, %c0_0] : memref<8x1xi32, #tpu.memory_space<vmem>>, vector<8x1xi32>
    %1 = tpu.iota {dimensions = array<i32: 1>} : vector<8x48xi32>
    %2 = vector.broadcast %0 : vector<8x1xi32> to vector<8x48xi32>
    %3 = arith.cmpi eq, %1, %2 : vector<8x48xi32>
    %4 = arith.extui %3 : vector<8x48xi1> to vector<8x48xi32>
    %5 = arith.sitofp %4 : vector<8x48xi32> to vector<8x48xf32>
    %c0_1 = arith.constant 0 : index
    %c0_2 = arith.constant 0 : index
    %6 = vector.load %arg4[%c0_1, %c0_2] : memref<48x32xf32, #tpu.memory_space<vmem>>, vector<48x32xf32>
    %cst = arith.constant dense<0.000000e+00> : vector<8x32xf32>
    %7 = tpu.matmul %5, %6, %cst {dimension_numbers = #tpu.dot_dimension_numbers<[1], [0], [0], [1], [0, 0, 1, 1], [], []>} : vector<8x48xf32>, vector<48x32xf32>, vector<8x32xf32> -> vector<8x32xf32>
    %c0_3 = arith.constant 0 : index
    %c0_4 = arith.constant 0 : index
    %8 = vector.load %arg2[%c0_3, %c0_4] : memref<8x32xf32, #tpu.memory_space<vmem>>, vector<8x32xf32>
    %c0_5 = arith.constant 0 : index
    %c0_6 = arith.constant 0 : index
    %c0_7 = arith.constant 0 : index
    %9 = vector.load %arg3[%c0_5, %c0_6, %c0_7] : memref<8x16x64xf32, #tpu.memory_space<vmem>>, vector<8x16x64xf32>
    %c0_8 = arith.constant 0 : index
    %c0_9 = arith.constant 0 : index
    %10 = vector.load %arg5[%c0_8, %c0_9] : memref<32x32xf32, #tpu.memory_space<vmem>>, vector<32x32xf32>
    %cst_10 = arith.constant dense<0.000000e+00> : vector<8x32xf32>
    %11 = tpu.matmul %8, %10, %cst_10 {dimension_numbers = #tpu.dot_dimension_numbers<[1], [0], [0], [1], [0, 0, 1, 1], [], []>} : vector<8x32xf32>, vector<32x32xf32>, vector<8x32xf32> -> vector<8x32xf32>
    %12 = vector.shape_cast %9 : vector<8x16x64xf32> to vector<128x64xf32>
    %c0_11 = arith.constant 0 : index
    %c0_12 = arith.constant 0 : index
    %13 = vector.load %arg6[%c0_11, %c0_12] : memref<64x32xf32, #tpu.memory_space<vmem>>, vector<64x32xf32>
    %cst_13 = arith.constant dense<0.000000e+00> : vector<128x32xf32>
    %14 = tpu.matmul %12, %13, %cst_13 {dimension_numbers = #tpu.dot_dimension_numbers<[1], [0], [0], [1], [0, 0, 1, 1], [], []>} : vector<128x64xf32>, vector<64x32xf32>, vector<128x32xf32> -> vector<128x32xf32>
    %15 = vector.shape_cast %14 : vector<128x32xf32> to vector<8x16x32xf32>
    %16 = vector.shape_cast %11 : vector<8x32xf32> to vector<8x1x32xf32>
    %17 = vector.broadcast %16 : vector<8x1x32xf32> to vector<8x16x32xf32>
    %18 = arith.addf %17, %15 : vector<8x16x32xf32>
    %c0_14 = arith.constant 0 : index
    %c0_15 = arith.constant 0 : index
    %19 = vector.load %arg7[%c0_14, %c0_15] : memref<1x32xf32, #tpu.memory_space<vmem>>, vector<1x32xf32>
    %20 = vector.shape_cast %19 : vector<1x32xf32> to vector<1x1x32xf32>
    %21 = vector.broadcast %20 : vector<1x1x32xf32> to vector<8x16x32xf32>
    %22 = arith.addf %18, %21 : vector<8x16x32xf32>
    %23 = math.tanh %22 : vector<8x16x32xf32>
    %c0_16 = arith.constant 0 : index
    %c0_17 = arith.constant 0 : index
    %24 = vector.load %arg8[%c0_16, %c0_17] : memref<1x32xf32, #tpu.memory_space<vmem>>, vector<1x32xf32>
    %25 = vector.shape_cast %24 : vector<1x32xf32> to vector<1x1x32xf32>
    %26 = vector.broadcast %25 : vector<1x1x32xf32> to vector<8x16x32xf32>
    %27 = arith.mulf %23, %26 : vector<8x16x32xf32>
    %cst_18 = arith.constant dense<0.000000e+00> : vector<8x16xf32>
    %28 = vector.multi_reduction <add>, %27, %cst_18 [2] : vector<8x16x32xf32> to vector<8x16xf32>
    %cst_19 = arith.constant dense<0xFF800000> : vector<8xf32>
    %29 = vector.multi_reduction <maximumf>, %28, %cst_19 [1] : vector<8x16xf32> to vector<8xf32>
    %30 = vector.shape_cast %29 : vector<8xf32> to vector<8x1xf32>
    %31 = vector.broadcast %30 : vector<8x1xf32> to vector<8x16xf32>
    %32 = arith.subf %28, %31 : vector<8x16xf32>
    %33 = math.exp %32 : vector<8x16xf32>
    %cst_20 = arith.constant dense<0.000000e+00> : vector<8xf32>
    %34 = vector.multi_reduction <add>, %33, %cst_20 [1] : vector<8x16xf32> to vector<8xf32>
    %35 = vector.shape_cast %34 : vector<8xf32> to vector<8x1xf32>
    %36 = vector.broadcast %35 : vector<8x1xf32> to vector<8x16xf32>
    %37 = arith.divf %33, %36 : vector<8x16xf32>
    %c0_21 = arith.constant 0 : index
    %c0_22 = arith.constant 0 : index
    %38 = vector.load %arg20[%c0_21, %c0_22] : memref<8x16xf32, #tpu.memory_space<vmem>>, vector<8x16xf32>
    tpu.vector_store %arg20[%c0_21, %c0_22], %37 {strides = array<i32>} : memref<8x16xf32, #tpu.memory_space<vmem>>, vector<8x16xf32>,
    %39 = vector.shape_cast %37 : vector<8x16xf32> to vector<8x16x1xf32>
    %40 = vector.broadcast %39 : vector<8x16x1xf32> to vector<8x16x64xf32>
    %41 = arith.mulf %40, %9 : vector<8x16x64xf32>
    %cst_23 = arith.constant dense<0.000000e+00> : vector<8x64xf32>
    %42 = vector.multi_reduction <add>, %41, %cst_23 [1] : vector<8x16x64xf32> to vector<8x64xf32>
    %c0_24 = arith.constant 0 : index
    %c0_25 = arith.constant 0 : index
    %43 = vector.load %arg9[%c0_24, %c0_25] : memref<32x96xf32, #tpu.memory_space<vmem>>, vector<32x96xf32>
    %cst_26 = arith.constant dense<0.000000e+00> : vector<8x96xf32>
    %44 = tpu.matmul %7, %43, %cst_26 {dimension_numbers = #tpu.dot_dimension_numbers<[1], [0], [0], [1], [0, 0, 1, 1], [], []>} : vector<8x32xf32>, vector<32x96xf32>, vector<8x96xf32> -> vector<8x96xf32>
    %c0_27 = arith.constant 0 : index
    %c0_28 = arith.constant 0 : index
    %45 = vector.load %arg10[%c0_27, %c0_28] : memref<64x96xf32, #tpu.memory_space<vmem>>, vector<64x96xf32>
    %cst_29 = arith.constant dense<0.000000e+00> : vector<8x96xf32>
    %46 = tpu.matmul %42, %45, %cst_29 {dimension_numbers = #tpu.dot_dimension_numbers<[1], [0], [0], [1], [0, 0, 1, 1], [], []>} : vector<8x64xf32>, vector<64x96xf32>, vector<8x96xf32> -> vector<8x96xf32>
    %47 = arith.addf %44, %46 : vector<8x96xf32>
    %c0_30 = arith.constant 0 : index
    %c0_31 = arith.constant 0 : index
    %48 = vector.load %arg11[%c0_30, %c0_31] : memref<1x96xf32, #tpu.memory_space<vmem>>, vector<1x96xf32>
    %49 = vector.broadcast %48 : vector<1x96xf32> to vector<8x96xf32>
    %50 = arith.addf %47, %49 : vector<8x96xf32>
    %c0_32 = arith.constant 0 : index
    %c0_33 = arith.constant 0 : index
    %51 = vector.load %arg12[%c0_32, %c0_33] : memref<32x96xf32, #tpu.memory_space<vmem>>, vector<32x96xf32>
    %cst_34 = arith.constant dense<0.000000e+00> : vector<8x96xf32>
    %52 = tpu.matmul %8, %51, %cst_34 {dimension_numbers = #tpu.dot_dimension_numbers<[1], [0], [0], [1], [0, 0, 1, 1], [], []>} : vector<8x32xf32>, vector<32x96xf32>, vector<8x96xf32> -> vector<8x96xf32>
    %c0_35 = arith.constant 0 : index
    %c0_36 = arith.constant 0 : index
    %53 = vector.load %arg13[%c0_35, %c0_36] : memref<1x96xf32, #tpu.memory_space<vmem>>, vector<1x96xf32>
    %54 = vector.broadcast %53 : vector<1x96xf32> to vector<8x96xf32>
    %55 = arith.addf %52, %54 : vector<8x96xf32>
    %56 = vector.extract_strided_slice %50 {offsets = [0, 0], sizes = [8, 32], strides = [1, 1]} : vector<8x96xf32> to vector<8x32xf32>
    %57 = vector.extract_strided_slice %55 {offsets = [0, 0], sizes = [8, 32], strides = [1, 1]} : vector<8x96xf32> to vector<8x32xf32>
    %58 = arith.addf %56, %57 : vector<8x32xf32>
    %59 = arith.negf %58 : vector<8x32xf32>
    %60 = math.exp %59 : vector<8x32xf32>
    %cst_37 = arith.constant 1.000000e+00 : f32
    %61 = vector.broadcast %cst_37 : f32 to vector<8x32xf32>
    %62 = arith.addf %61, %60 : vector<8x32xf32>
    %63 = arith.divf %61, %62 : vector<8x32xf32>
    %64 = vector.extract_strided_slice %50 {offsets = [0, 32], sizes = [8, 32], strides = [1, 1]} : vector<8x96xf32> to vector<8x32xf32>
    %65 = vector.extract_strided_slice %55 {offsets = [0, 32], sizes = [8, 32], strides = [1, 1]} : vector<8x96xf32> to vector<8x32xf32>
    %66 = arith.addf %64, %65 : vector<8x32xf32>
    %67 = arith.negf %66 : vector<8x32xf32>
    %68 = math.exp %67 : vector<8x32xf32>
    %cst_38 = arith.constant 1.000000e+00 : f32
    %69 = vector.broadcast %cst_38 : f32 to vector<8x32xf32>
    %70 = arith.addf %69, %68 : vector<8x32xf32>
    %71 = arith.divf %69, %70 : vector<8x32xf32>
    %72 = vector.extract_strided_slice %50 {offsets = [0, 64], sizes = [8, 32], strides = [1, 1]} : vector<8x96xf32> to vector<8x32xf32>
    %73 = vector.extract_strided_slice %55 {offsets = [0, 64], sizes = [8, 32], strides = [1, 1]} : vector<8x96xf32> to vector<8x32xf32>
    %74 = arith.mulf %63, %73 : vector<8x32xf32>
    %75 = arith.addf %72, %74 : vector<8x32xf32>
    %76 = math.tanh %75 : vector<8x32xf32>
    %cst_39 = arith.constant 1.000000e+00 : f32
    %77 = vector.broadcast %cst_39 : f32 to vector<8x32xf32>
    %78 = arith.subf %77, %71 : vector<8x32xf32>
    %79 = arith.mulf %78, %76 : vector<8x32xf32>
    %80 = arith.mulf %71, %8 : vector<8x32xf32>
    %81 = arith.addf %79, %80 : vector<8x32xf32>
    %c0_40 = arith.constant 0 : index
    %c0_41 = arith.constant 0 : index
    %82 = vector.load %arg19[%c0_40, %c0_41] : memref<8x32xf32, #tpu.memory_space<vmem>>, vector<8x32xf32>
    tpu.vector_store %arg19[%c0_40, %c0_41], %81 {strides = array<i32>} : memref<8x32xf32, #tpu.memory_space<vmem>>, vector<8x32xf32>,
    %c0_42 = arith.constant 0 : index
    %c0_43 = arith.constant 0 : index
    %83 = vector.load %arg14[%c0_42, %c0_43] : memref<32x128xf32, #tpu.memory_space<vmem>>, vector<32x128xf32>
    %cst_44 = arith.constant dense<0.000000e+00> : vector<8x128xf32>
    %84 = tpu.matmul %81, %83, %cst_44 {dimension_numbers = #tpu.dot_dimension_numbers<[1], [0], [0], [1], [0, 0, 1, 1], [], []>} : vector<8x32xf32>, vector<32x128xf32>, vector<8x128xf32> -> vector<8x128xf32>
    %c0_45 = arith.constant 0 : index
    %c0_46 = arith.constant 0 : index
    %85 = vector.load %arg15[%c0_45, %c0_46] : memref<64x128xf32, #tpu.memory_space<vmem>>, vector<64x128xf32>
    %cst_47 = arith.constant dense<0.000000e+00> : vector<8x128xf32>
    %86 = tpu.matmul %42, %85, %cst_47 {dimension_numbers = #tpu.dot_dimension_numbers<[1], [0], [0], [1], [0, 0, 1, 1], [], []>} : vector<8x64xf32>, vector<64x128xf32>, vector<8x128xf32> -> vector<8x128xf32>
    %87 = arith.addf %84, %86 : vector<8x128xf32>
    %c0_48 = arith.constant 0 : index
    %c0_49 = arith.constant 0 : index
    %88 = vector.load %arg16[%c0_48, %c0_49] : memref<32x128xf32, #tpu.memory_space<vmem>>, vector<32x128xf32>
    %cst_50 = arith.constant dense<0.000000e+00> : vector<8x128xf32>
    %89 = tpu.matmul %7, %88, %cst_50 {dimension_numbers = #tpu.dot_dimension_numbers<[1], [0], [0], [1], [0, 0, 1, 1], [], []>} : vector<8x32xf32>, vector<32x128xf32>, vector<8x128xf32> -> vector<8x128xf32>
    %90 = arith.addf %87, %89 : vector<8x128xf32>
    %c0_51 = arith.constant 0 : index
    %c0_52 = arith.constant 0 : index
    %91 = vector.load %arg17[%c0_51, %c0_52] : memref<1x128xf32, #tpu.memory_space<vmem>>, vector<1x128xf32>
    %92 = vector.broadcast %91 : vector<1x128xf32> to vector<8x128xf32>
    %93 = arith.addf %90, %92 : vector<8x128xf32>
    %c0_53 = arith.constant 0 : index
    %c0_54 = arith.constant 0 : index
    %94 = vector.load %arg18[%c0_53, %c0_54] : memref<8x128xf32, #tpu.memory_space<vmem>>, vector<8x128xf32>
    tpu.vector_store %arg18[%c0_53, %c0_54], %93 {strides = array<i32>} : memref<8x128xf32, #tpu.memory_space<vmem>>, vector<8x128xf32>,
    return
  }
  func.func @transform_0(%arg0: i32) -> (i32, i32) {
    %c0_i32 = arith.constant 0 : i32
    %c0_i32_0 = arith.constant 0 : i32
    %c0_i32_1 = arith.constant 0 : i32
    return %c0_i32, %c0_i32_0 : i32, i32
  }
  func.func @transform_1(%arg0: i32) -> (i32, i32) {
    %c0_i32 = arith.constant 0 : i32
    %c0_i32_0 = arith.constant 0 : i32
    %c0_i32_1 = arith.constant 0 : i32
    return %c0_i32, %c0_i32_0 : i32, i32
  }
  func.func @transform_2(%arg0: i32) -> (i32, i32, i32) {
    %c0_i32 = arith.constant 0 : i32
    %c0_i32_0 = arith.constant 0 : i32
    %c0_i32_1 = arith.constant 0 : i32
    %c0_i32_2 = arith.constant 0 : i32
    return %c0_i32, %c0_i32_0, %c0_i32_1 : i32, i32, i32
  }
  func.func @transform_3(%arg0: i32) -> (i32, i32) {
    %c0_i32 = arith.constant 0 : i32
    %c0_i32_0 = arith.constant 0 : i32
    %c0_i32_1 = arith.constant 0 : i32
    return %c0_i32, %c0_i32_0 : i32, i32
  }
  func.func @transform_4(%arg0: i32) -> (i32, i32) {
    %c0_i32 = arith.constant 0 : i32
    %c0_i32_0 = arith.constant 0 : i32
    %c0_i32_1 = arith.constant 0 : i32
    return %c0_i32, %c0_i32_0 : i32, i32
  }
  func.func @transform_5(%arg0: i32) -> (i32, i32) {
    %c0_i32 = arith.constant 0 : i32
    %c0_i32_0 = arith.constant 0 : i32
    %c0_i32_1 = arith.constant 0 : i32
    return %c0_i32, %c0_i32_0 : i32, i32
  }
  func.func @transform_6(%arg0: i32) -> (i32, i32) {
    %c0_i32 = arith.constant 0 : i32
    %c0_i32_0 = arith.constant 0 : i32
    %c0_i32_1 = arith.constant 0 : i32
    return %c0_i32, %c0_i32_0 : i32, i32
  }
  func.func @transform_7(%arg0: i32) -> (i32, i32) {
    %c0_i32 = arith.constant 0 : i32
    %c0_i32_0 = arith.constant 0 : i32
    %c0_i32_1 = arith.constant 0 : i32
    return %c0_i32, %c0_i32_0 : i32, i32
  }
  func.func @transform_8(%arg0: i32) -> (i32, i32) {
    %c0_i32 = arith.constant 0 : i32
    %c0_i32_0 = arith.constant 0 : i32
    %c0_i32_1 = arith.constant 0 : i32
    return %c0_i32, %c0_i32_0 : i32, i32
  }
  func.func @transform_9(%arg0: i32) -> (i32, i32) {
    %c0_i32 = arith.constant 0 : i32
    %c0_i32_0 = arith.constant 0 : i32
    %c0_i32_1 = arith.constant 0 : i32
    return %c0_i32, %c0_i32_0 : i32, i32
  }
  func.func @transform_10(%arg0: i32) -> (i32, i32) {
    %c0_i32 = arith.constant 0 : i32
    %c0_i32_0 = arith.constant 0 : i32
    %c0_i32_1 = arith.constant 0 : i32
    return %c0_i32, %c0_i32_0 : i32, i32
  }
  func.func @transform_11(%arg0: i32) -> (i32, i32) {
    %c0_i32 = arith.constant 0 : i32
    %c0_i32_0 = arith.constant 0 : i32
    %c0_i32_1 = arith.constant 0 : i32
    return %c0_i32, %c0_i32_0 : i32, i32
  }
  func.func @transform_12(%arg0: i32) -> (i32, i32) {
    %c0_i32 = arith.constant 0 : i32
    %c0_i32_0 = arith.constant 0 : i32
    %c0_i32_1 = arith.constant 0 : i32
    return %c0_i32, %c0_i32_0 : i32, i32
  }
  func.func @transform_13(%arg0: i32) -> (i32, i32) {
    %c0_i32 = arith.constant 0 : i32
    %c0_i32_0 = arith.constant 0 : i32
    %c0_i32_1 = arith.constant 0 : i32
    return %c0_i32, %c0_i32_0 : i32, i32
  }
  func.func @transform_14(%arg0: i32) -> (i32, i32) {
    %c0_i32 = arith.constant 0 : i32
    %c0_i32_0 = arith.constant 0 : i32
    %c0_i32_1 = arith.constant 0 : i32
    return %c0_i32, %c0_i32_0 : i32, i32
  }
  func.func @transform_15(%arg0: i32) -> (i32, i32) {
    %c0_i32 = arith.constant 0 : i32
    %c0_i32_0 = arith.constant 0 : i32
    %c0_i32_1 = arith.constant 0 : i32
    return %c0_i32, %c0_i32_0 : i32, i32
  }
  func.func @transform_16(%arg0: i32) -> (i32, i32) {
    %c0_i32 = arith.constant 0 : i32
    %c0_i32_0 = arith.constant 0 : i32
    %c0_i32_1 = arith.constant 0 : i32
    return %c0_i32, %c0_i32_0 : i32, i32
  }
  func.func @transform_17(%arg0: i32) -> (i32, i32) {
    %c0_i32 = arith.constant 0 : i32
    %c0_i32_0 = arith.constant 0 : i32
    %c0_i32_1 = arith.constant 0 : i32
    return %c0_i32, %c0_i32_0 : i32, i32
  }
  func.func @transform_18(%arg0: i32) -> (i32, i32) {
    %c0_i32 = arith.constant 0 : i32
    %c0_i32_0 = arith.constant 0 : i32
    %c0_i32_1 = arith.constant 0 : i32
    return %c0_i32, %c0_i32_0 : i32, i32
  }
  func.func @transform_19(%arg0: i32) -> (i32, i32) {
    %c0_i32 = arith.constant 0 : i32
    %c0_i32_0 = arith.constant 0 : i32
    %c0_i32_1 = arith.constant 0 : i32
    return %c0_i32, %c0_i32_0 : i32, i32
  }
}

</mosaic_0001>

<bundles_post_ra>
// kernel: tpu_custom_call.1
= control target key start
LH: loop header
LB: loop body
LE: loop exit
PB: predicated region body
PF: predicated region fallthrough
CT: control target
= control target key end

     0   :  { %s2727_s0 = inlined_call_operand.vmem [shape: s32[8,1], index: 0, kind: input, shape index: {}]   ;;  %s2728_s1 = inlined_call_operand.hbm [shape: f32[8,32], index: 1, kind: input, shape index: {}]   ;;  %s2729_s2 = inlined_call_operand.vmem [shape: f32[8,16,64], index: 2, kind: input, shape index: {}]   ;;  %s2730_s3 = inlined_call_operand.vmem [shape: f32[48,32], index: 3, kind: input, shape index: {}]   ;;  %s2731_s4 = inlined_call_operand.hbm [shape: f32[32,32], index: 4, kind: input, shape index: {}]   ;;  %s2732_s5 = inlined_call_operand.vmem [shape: f32[64,32], index: 5, kind: input, shape index: {}]   ;;  %s2733_s6 = inlined_call_operand.vmem [shape: f32[1,32], index: 6, kind: input, shape index: {}]   ;;  %s2734_s7 = inlined_call_operand.hbm [shape: f32[1,32], index: 7, kind: input, shape index: {}]   ;;  %s2735_s8 = inlined_call_operand.hbm [shape: f32[32,96], index: 8, kind: input, shape index: {}]   ;;  %s2736_s9 = inlined_call_operand.hbm [shape: f32[64,96], index: 9, kind: input, shape index: {}]   ;;  %s2737_s10 = inlined_call_operand.hbm [shape: f32[1,96], index: 10, kind: input, shape index: {}]   ;;  %s2738_s11 = inlined_call_operand.vmem [shape: f32[32,96], index: 11, kind: input, shape index: {}]   ;;  %s2739_s12 = inlined_call_operand.vmem [shape: f32[1,96], index: 12, kind: input, shape index: {}]   ;;  %s2740_s13 = inlined_call_operand.hbm [shape: f32[32,128], index: 13, kind: input, shape index: {}]   ;;  %s2741_s14 = inlined_call_operand.hbm [shape: f32[64,128], index: 14, kind: input, shape index: {}]   ;;  %s2742_s15 = inlined_call_operand.hbm [shape: f32[32,128], index: 15, kind: input, shape index: {}]   ;;  %s2743_s16 = inlined_call_operand.vmem [shape: f32[1,128], index: 16, kind: input, shape index: {}]   ;;  %s2744_s17 = inlined_call_operand.hbm [shape: f32[8,128], index: 17, kind: output, shape index: {0}]   ;;  %s2745_s18 = inlined_call_operand.hbm [shape: f32[8,32], index: 18, kind: output, shape index: {1}]   ;;  %s2746_s19 = inlined_call_operand.hbm [shape: f32[8,16], index: 19, kind: output, shape index: {2}]  }
   0x1   :  { %2751 = sst [smem:[#allocation28_spill]] %s2727_s0 }
   0x2   :  { %2752 = sst [smem:[#allocation29_spill]] %s2728_s1 }
   0x3   :  { %2753 = sst [smem:[#allocation30_spill]] %s2729_s2 }
   0x4   :  { %2754 = sst [smem:[#allocation31_spill]] %s2730_s3 }
   0x5   :  { %25 = vsyncpa [#allocation3], 0 }
   0x6   :  { %26 = vsyncpa [#allocation6], 0 }
   0x7   :  { %27 = vsyncpa [#allocation9], 0 }
   0x8   :  { %28 = vsyncpa [#allocation12], 0 }
   0x9   :  { %29 = vsyncpa [#allocation15], 0 }
   0xa   :  { %30 = vsyncpa [#allocation4], 0  ;;  %s53_s20 = sshll.u32 %s2731_s4, 4  ;;  %s54_s20 = int_to_ptr.hbm [resolvable:$true] %s53_s20 }
   0xb   :  { %31 = vsyncpa [#allocation19], 0  ;;  %s1887_s21 = smov [#allocation5]   ;;  %s81_s23 = sshll.u32 %s2735_s8, 4  ;;  %s82_s23 = int_to_ptr.hbm [resolvable:$true] %s81_s23 }
   0xc   :  { %s55_s1 = sshll.u32 %s1887_s21, 4  ;;  %s1888_s24 = smov 128   ;;  %s56_s1 = int_to_ptr.vmem [resolvable:$true] %s55_s1 }
   0xd   :  { %s1889_s25 = smov 8   ;;  %s1890_s3 = smov [#allocation8]  }
   0xe   :  { %61 = dma.hbm_to_vmem [thread:$0]  %s54_s20, 512, %s56_s1, [#allocation6], %s1888_s24, %s1888_s24, %s1889_s25  }
   0xf   :  { %s83_s26 = sshll.u32 %s1890_s3, 4  ;;  %s108_s28 = sshll.u32 %s2737_s10, 4  ;;  %s84_s26 = int_to_ptr.vmem [resolvable:$true] %s83_s26  ;;  %s109_s28 = int_to_ptr.hbm [resolvable:$true] %s108_s28 }
  0x10   :  { %89 = dma.hbm_to_vmem [thread:$0]  %s82_s23, 512, %s84_s26, [#allocation9], %s1888_s24, %s1888_s24, %s1889_s25  }
  0x11   :  { %s135_s0 = sshll.u32 %s2741_s14, 4  ;;  %s1891_s30 = smov [#allocation11]   ;;  %s136_s0 = int_to_ptr.hbm [resolvable:$true] %s135_s0 }
  0x12   :  { %s110_s21 = sshll.u32 %s1891_s30, 4  ;;  %s1892_s20 = smov [#allocation14]   ;;  %s111_s21 = int_to_ptr.vmem [resolvable:$true] %s110_s21 }
  0x13   :  { %113 = dma.hbm_to_vmem [thread:$0]  %s109_s28, 16, %s111_s21, [#allocation12]  }
  0x14   :  { %s137_s1 = sshll.u32 %s1892_s20, 4  ;;  %s2755_s10 = sld [smem:[#allocation29_spill]]  ;;  %s138_s1 = int_to_ptr.vmem [resolvable:$true] %s137_s1 }
  0x15   :  { %143 = dma.hbm_to_vmem [thread:$0]  %s136_s0, 1024, %s138_s1, [#allocation15], %s1888_s24, %s1888_s24, %s1889_s25  }
  0x16   :  { %s71_s14 = sshll.u32 %s2734_s7, 4  ;;  %s1893_s27 = smov [#allocation2]   ;;  %s72_s14 = int_to_ptr.hbm [resolvable:$true] %s71_s14 }
  0x17   :  { %s41_s4 = sshll.u32 %s1893_s27, 4  ;;  %s1894_s28 = smov [#allocation7]   ;;  %s42_s4 = int_to_ptr.vmem [resolvable:$true] %s41_s4 }
  0x18   :  { %s73_s8 = sshll.u32 %s1894_s28, 4  ;;  %s94_s21 = sshll.u32 %s2736_s9, 4  ;;  %s74_s8 = int_to_ptr.vmem [resolvable:$true] %s73_s8  ;;  %s95_s21 = int_to_ptr.hbm [resolvable:$true] %s94_s21 }
  0x19   :  { %76 = dma.hbm_to_vmem [thread:$0]  %s72_s14, 16, %s74_s8, [#allocation6]  }
  0x1a   :  { %s39_s3 = sshll.u32 %s2755_s10, 4  ;;  %s122_s1 = sshll.u32 %s2740_s13, 4  ;;  %s40_s3 = int_to_ptr.hbm [resolvable:$true] %s39_s3  ;;  %s123_s1 = int_to_ptr.hbm [resolvable:$true] %s122_s1 }
  0x1b   :  { %44 = dma.hbm_to_vmem [thread:$0]  %s40_s3, 128, %s42_s4, [#allocation3]  }
  0x1c   :  { %s1895_s22 = smov [#allocation10]   ;;  %s1896_s2 = smov [#allocation13]  }
  0x1d   :  { %s96_s7 = sshll.u32 %s1895_s22, 4  ;;  %s124_s10 = sshll.u32 %s1896_s2, 4  ;;  %s97_s7 = int_to_ptr.vmem [resolvable:$true] %s96_s7  ;;  %s125_s10 = int_to_ptr.vmem [resolvable:$true] %s124_s10 }
  0x1e   :  { %102 = dma.hbm_to_vmem [thread:$0]  %s95_s21, 1024, %s97_s7, [#allocation9], %s1888_s24, %s1888_s24, %s1889_s25  }
  0x1f   :  { %s148_s9 = sshll.u32 %s2742_s15, 4  ;;  %s1897_s13 = smov [#allocation16]   ;;  %s149_s9 = int_to_ptr.hbm [resolvable:$true] %s148_s9 }
  0x20   :  { %130 = dma.hbm_to_vmem [thread:$0]  %s123_s1, 512, %s125_s10, [#allocation12], %s1888_s24, %s1888_s24, %s1889_s25  }
  0x21   :  { %s150_s26 = sshll.u32 %s1897_s13, 4  ;;  %s151_s26 = int_to_ptr.vmem [resolvable:$true] %s150_s26 }
  0x22   :  { %156 = dma.hbm_to_vmem [thread:$0]  %s149_s9, 512, %s151_s26, [#allocation15], %s1888_s24, %s1888_s24, %s1889_s25  }
  0x23   :  { %1873 = dma.done.wait [#allocation3], 128  }
  0x24   :  { %1874 = vsyncadd [#allocation3], 4294967168 }
  0x25   :  { %1875 = dma.done.wait [#allocation6], 528  }
  0x26   :  { %1876 = vsyncadd [#allocation6], 4294966768 }
  0x27   :  { %1877 = dma.done.wait [#allocation9], 1536  }
  0x28   :  { %1878 = vsyncadd [#allocation9], 4294965760 }
  0x29   :  { %1879 = dma.done.wait [#allocation12], 528  }
  0x2a   :  { %1880 = vsyncadd [#allocation12], 4294966768 }
  0x2b   :  { %1881 = dma.done.wait [#allocation15], 1536  }
  0x2c   :  { %1882 = vsyncadd [#allocation15], 4294965760  ;;  %v1898_v0 = vmov 0   ;;  %s2756_s27 = sld [smem:[#allocation28_spill]]  ;;  %v254_v2 = vld [vmem:[#allocation5 + $0x18] sm:$0xff]  ;;  %v2057_v3 = vld [vmem:[%s2732_s5 + $0x38] sm:$0xff]  ;;  %v196_v34 = vlaneseq }
  0x2d   :  { %1474 = vset.pattern.permute.xlu0 %v1898_v0  ;;  %1476 = vset.pattern.permute.xlu1 %v1898_v0  ;;  %v253_v4 = vld [vmem:[#allocation5 + $0x10] sm:$0xff]  ;;  %v2062_v5 = vld [vmem:[%s2732_s5 + $0x30] sm:$0xff]  ;;  %v2069_v7 = vld [vmem:[%s2732_s5 + $0x28] sm:$0xff]  ;;  %vm2749_vm0 = vcmask 261120   ;;  %s2757_s13 = sld [smem:[#allocation30_spill]]  ;;  %vm287_vm1 = vcmask 523264  }
  0x2e   :  { %1475 = vset.pattern.permute.xlu2 %v1898_v0  ;;  %271 = vmatpush.msra.mxu1 %v254_v2  ;;  %v252_v6 = vld [vmem:[#allocation5 + $0x8] sm:$0xff]  ;;  %v251_v8 = vld [vmem:[#allocation5] sm:$0xff]  ;;  %v2076_v9 = vld [vmem:[%s2732_s5 + $0x20] sm:$0xff]  ;;  %s2758_s29 = sld [smem:[#allocation31_spill]]  ;;  %v2182_v35 = vand.u32 127, %v196_v34  ;;  %vm210_vm2 = vcmask 392192  }
  0x2f   :  { %1432 = vmatpush.msra.mxu2 %v2057_v3  ;;  %1433 = vmatpush.msra.mxu3 %v2057_v3  ;;  %v2082_v10 = vld [vmem:[%s2732_s5 + $0x18] sm:$0xff]  ;;  %v2084_v11 = vld [vmem:[#allocation2] sm:$0xff]  ;;  %v281_v12 = vld [vmem:[%s2732_s5 + $0x10] sm:$0xff]  ;;  %v1899_v37 = vmov 0.0   ;;  %vm564_vm4 = vcmask 130112   ;;  %vm587_vm5 = vcmask 1041409  }
  0x30   :  { %272 = vmatpush.msra.mxu1 %v253_v4  ;;  %v280_v13 = vld [vmem:[%s2732_s5 + $0x8] sm:$0xff]  ;;  %v279_v14 = vld [vmem:[%s2732_s5] sm:$0xff]  ;;  %vm589_vm6 = vcmask 1042434   ;;  %vm591_vm7 = vcmask 1043459   ;;  %vm593_vm8 = vcmask 1044484   ;;  %vm595_vm9 = vcmask 1045509  }
  0x31   :  { %1435 = vmatpush.msra.mxu2 %v2062_v5  ;;  %1436 = vmatpush.msra.mxu3 %v2062_v5  ;;  %v2209_v48 = vld [vmem:[%s2733_s6] ss:$0 sm:$0xff]  ;;  %v2218_v0 = vld [vmem:[#allocation7] ss:$0 sm:$0xff]  ;;  %vm597_vm10 = vcmask 1046534   ;;  %vm599_vm11 = vcmask 1047559  }
  0x32   :  { %v195_v1 = vld [vmem:[%s2756_s27] sm:$0xff]  ;;  %273 = vmatpush.msra.mxu1 %v252_v6  ;;  %vm2750_vm12 = vcmask 130048   ;;  %s1900_s4 = smov 64   ;;  %s1901_s28 = smov 32  }
  0x33   :  { %199 = vperm.xlu0 %1474, %v195_v1   ;;  %1438 = vmatpush.msra.mxu2 %v2069_v7  ;;  %v240_v15 = vld [vmem:[%s2757_s13 + $0x28] sm:$0xff]  ;;  %v246_v16 = vld [vmem:[%s2757_s13 + $0x58] sm:$0xff]  ;;  %v241_v18 = vld [vmem:[%s2757_s13 + $0x30] sm:$0xff]  ;;  %s1371_s22 = sshll.u32 %s2745_s18, 4  ;;  %s1903_s7 = smov [#allocation18]   ;;  %s1372_s22 = int_to_ptr.hbm [resolvable:$true] %s1371_s22 }
  0x34   :  { %1439 = vmatpush.msra.mxu3 %v2069_v7  ;;  %274 = vmatpush.msra.mxu1 %v251_v8  ;;  %v238_v17 = vld [vmem:[%s2757_s13 + $0x18] sm:$0xff]  ;;  %v247_v19 = vld [vmem:[%s2757_s13 + $0x60] sm:$0xff]  ;;  %v209_v20 = vld [vmem:[%s2758_s29 + $0x28] sm:$0xff]  ;;  %s1369_s2 = sshll.u32 %s1903_s7, 4  ;;  %s1382_s23 = sshll.u32 %s2746_s19, 4  ;;  %s1370_s2 = int_to_ptr.vmem [resolvable:$true] %s1369_s2  ;;  %s1383_s23 = int_to_ptr.hbm [resolvable:$true] %s1382_s23 }
  0x35   :  { %1441 = vmatpush.msra.mxu2 %v2076_v9  ;;  %1407 = vmatmul.msk.f32.vlgmr.msra.gmra.mxu1 %vm2749_vm0, %v2084_v11  ;;  %v208_v21 = vld [vmem:[%s2758_s29 + $0x20] sm:$0xff]  ;;  %v207_v22 = vld [vmem:[%s2758_s29 + $0x18] sm:$0xff]  ;;  %v206_v24 = vld [vmem:[%s2758_s29 + $0x10] sm:$0xff]  ;;  %s1904_s6 = smov [#allocation20]   ;;  %s1905_s18 = smov [#allocation17]  }
  0x36   :  { %1431 = vmatpush.msrb.mxu1 %v2057_v3  ;;  %1442 = vmatpush.msra.mxu3 %v2076_v9  ;;  %v239_v23 = vld [vmem:[%s2757_s13 + $0x20] sm:$0xff]  ;;  %v242_v25 = vld [vmem:[%s2757_s13 + $0x38] sm:$0xff]  ;;  %v248_v26 = vld [vmem:[%s2757_s13 + $0x68] sm:$0xff]  ;;  %s1380_s9 = sshll.u32 %s1904_s6, 4  ;;  %s1358_s5 = sshll.u32 %s1905_s18, 4  ;;  %s1381_s9 = int_to_ptr.vmem [resolvable:$true] %s1380_s9  ;;  %s1359_s5 = int_to_ptr.vmem [resolvable:$true] %s1358_s5 }
  0x37   :  { %1444 = vmatpush.msra.mxu2 %v2082_v10  ;;  %224 = vmatpush.msra.mxu0 %v209_v20  ;;  %v205_v27 = vld [vmem:[%s2758_s29 + $0x8] sm:$0xff]  ;;  %v204_v28 = vld [vmem:[%s2758_s29] sm:$0xff]  ;;  %v249_v30 = vld [vmem:[%s2757_s13 + $0x70] sm:$0xff]  ;;  %s1360_s24 = sshll.u32 %s2744_s17, 4  ;;  %s1361_s24 = int_to_ptr.hbm [resolvable:$true] %s1360_s24 }
  0x38   :  { %1434 = vmatpush.msrb.mxu1 %v2062_v5  ;;  %1445 = vmatpush.msra.mxu3 %v2082_v10  ;;  %v243_v29 = vld [vmem:[%s2757_s13 + $0x40] sm:$0xff]  ;;  %v244_v31 = vld [vmem:[%s2757_s13 + $0x48] sm:$0xff]  ;;  %v250_v32 = vld [vmem:[%s2757_s13 + $0x78] sm:$0xff] }
  0x39   :  { %1447 = vmatpush.msra.mxu2 %v281_v12  ;;  %225 = vmatpush.msra.mxu0 %v208_v21  ;;  %v245_v33 = vld [vmem:[%s2757_s13 + $0x50] sm:$0xff]  ;;  %v235_v39 = vld [vmem:[%s2757_s13] sm:$0xff]  ;;  %v236_v40 = vld [vmem:[%s2757_s13 + $0x8] sm:$0xff] }
  0x3a   :  { %1437 = vmatpush.msrb.mxu1 %v2069_v7  ;;  %1448 = vmatpush.msra.mxu3 %v281_v12  ;;  %v237_v42 = vld [vmem:[%s2757_s13 + $0x10] sm:$0xff] }
  0x3b   :  { %1450 = vmatpush.msra.mxu2 %v280_v13  ;;  %226 = vmatpush.msra.mxu0 %v207_v22 }
  0x3c   :  { %1440 = vmatpush.msrb.mxu1 %v2076_v9  ;;  %1451 = vmatpush.msra.mxu3 %v280_v13 }
  0x3d   :  { %1453 = vmatpush.msra.mxu2 %v279_v14  ;;  %227 = vmatpush.msra.mxu0 %v206_v24 }
  0x3e   :  { %1443 = vmatpush.msrb.mxu1 %v2082_v10  ;;  %1413 = vmatmul.msk.f32.vlgmr.msra.gmra.mxu2 %vm287_vm1, %v240_v15 }
  0x3f   :  { %1454 = vmatpush.msra.mxu3 %v279_v14  ;;  %228 = vmatpush.msra.mxu0 %v205_v27 }
  0x40   :  { %1446 = vmatpush.msrb.mxu1 %v281_v12  ;;  %1419 = vmatmul.msk.f32.vlgmr.msra.gmra.mxu3 %vm287_vm1, %v246_v16  ;;  %v1196_v16 = vld [vmem:[%s2738_s11 + $0x18] sm:$0xff] }
  0x41   :  { %229 = vmatpush.msra.mxu0 %v204_v28 }
  0x42   :  { %1449 = vmatpush.msrb.mxu1 %v280_v13 }
  0x43   :  { %344 = vmatpush.msrb.mxu0 %v2057_v3 }
  0x44   :  { %1452 = vmatpush.msrb.mxu1 %v279_v14 }
  0x45   :  { %1411 = vmatmul.msk.f32.vlgmr.msrb.gmra.mxu1 %vm287_vm1, %v238_v17  ;;  %345 = vmatpush.msrb.mxu0 %v2062_v5 }
  0x46   :  { %1414 = vmatmul.msk.f32.gmra.mxu2 %vm287_vm1, %v241_v18 }
  0x47   :  { %346 = vmatpush.msrb.mxu0 %v2069_v7 }
  0x48   :  { %1420 = vmatmul.msk.f32.gmra.mxu3 %vm287_vm1, %v247_v19 }
  0x49   :  { %347 = vmatpush.msrb.mxu0 %v2076_v9 }
  0x4b   :  { %348 = vmatpush.msrb.mxu0 %v2082_v10 }
  0x4d   :  { %1412 = vmatmul.msk.f32.gmra.mxu1 %vm287_vm1, %v239_v23  ;;  %349 = vmatpush.msrb.mxu0 %v281_v12 }
  0x4e   :  { %1415 = vmatmul.msk.f32.gmra.mxu2 %vm287_vm1, %v242_v25 }
  0x4f   :  { %350 = vmatpush.msrb.mxu0 %v280_v13 }
  0x50   :  { %1421 = vmatmul.msk.f32.gmra.mxu3 %vm287_vm1, %v248_v26 }
  0x51   :  { %351 = vmatpush.msrb.mxu0 %v279_v14 }
  0x56   :  { %1416 = vmatmul.msk.f32.gmra.mxu2 %vm287_vm1, %v243_v29 }
  0x58   :  { %1422 = vmatmul.msk.f32.gmra.mxu3 %vm287_vm1, %v249_v30 }
  0x5e   :  { %1417 = vmatmul.msk.f32.gmra.mxu2 %vm287_vm1, %v244_v31  ;;  %v1195_v31 = vld [vmem:[%s2738_s11 + $0x10] sm:$0xff] }
  0x60   :  { %1423 = vmatmul.msk.f32.gmra.mxu3 %vm287_vm1, %v250_v32  ;;  %v1194_v32 = vld [vmem:[%s2738_s11 + $0x8] sm:$0xff] }
  0x66   :  { %1418 = vmatmul.msk.f32.gmra.mxu2 %vm287_vm1, %v245_v33 }
  0xa5   :  { %v200_v36 = vpop.permute.xlu0 %199 }
  0xa6   :  { %vm201_vm3 = vcmp.eq.s32.totalorder %v2182_v35, %v200_v36  ;;  %v1119_v36 = vld [vmem:[#allocation8 + $0x18] sm:$0xff] }
  0xa7   :  { %v1405_v38 = vsel %vm201_vm3, 1.0, %v1899_v37  ;;  %v1118_v37 = vld [vmem:[#allocation8 + $0x10] sm:$0xff]  ;;  %1180 = vmatpush.msra.mxu1 %v1119_v36 }
  0xa8   :  { %1406 = vmatmul.msk.f32.vlgmr.msra.gmra.mxu0 %vm210_vm2, %v1405_v38 }
  0xa9   :  { %1213 = vmatpush.msra.mxu0 %v1196_v16  ;;  %1181 = vmatpush.msra.mxu1 %v1118_v37  ;;  %v1322_v16 = vld [vmem:[#allocation16] sm:$0xff] }
  0xab   :  { %1214 = vmatpush.msra.mxu0 %v1195_v31 }
  0xad   :  { %1215 = vmatpush.msra.mxu0 %v1194_v32 }
  0xb0   :  { %1408 = vmatmul.msk.f32.vlgmr.msrb.gmra.mxu0 %vm287_vm1, %v235_v39  ;;  %v1193_v39 = vld [vmem:[%s2738_s11] sm:$0xff] }
  0xb1   :  { %1216 = vmatpush.msra.mxu0 %v1193_v39 }
  0xb2   :  { %v2193_v41 = vpop.f32.mrf.mxu1 }
  0xb3   :  { %v402_v43 = vrot.slane %v2193_v41, 1  ;;  %v406_v44 = vrot.slane %v2193_v41, 5  ;;  %v403_v45 = vrot.slane %v2193_v41, 2  ;;  %v404_v54 = vrot.slane %v2193_v41, 3 }
  0xb4   :  { %v407_v61 = vrot.slane %v2193_v41, 6  ;;  %v405_v19 = vrot.slane %v2193_v41, 4 }
  0xb5   :  { %v2202_v46 = vperm.slane %v402_v43, 0  ;;  %v2204_v47 = vperm.slane %v406_v44, 0  ;;  %v411_v49 = vperm.slane %v403_v45, 0  ;;  %v412_v60 = vperm.slane %v404_v54, 0  ;;  %v1325_v43 = vld [vmem:[#allocation16 + $0x18] sm:$0xff]  ;;  %v1323_v54 = vld [vmem:[#allocation16 + $0x8] sm:$0xff] }
  0xb6   :  { %v415_v7 = vperm.slane %v407_v61, 0  ;;  %v413_v28 = vperm.slane %v405_v19, 0  ;;  %1338 = vmatpush.msrb.mxu0 %v1325_v43  ;;  %v409_v19 = vperm.slane %v2193_v41, 0 }
  0xb8   :  { %1409 = vmatmul.msk.f32.gmra.mxu0 %vm287_vm1, %v236_v40 }
  0xc0   :  { %1410 = vmatmul.msk.f32.gmra.mxu0 %vm287_vm1, %v237_v42 }
  0xc1   :  { %v368_v51 = vpop.f32.mrf.mxu2 }
  0xc2   :  { %v362_v50 = vpop.f32.mrf.mxu1  ;;  %v430_v53 = vadd.f32 %v411_v49, %v368_v51  ;;  %v408_v51 = vrot.slane %v2193_v41, 7 }
  0xc3   :  { %v428_v52 = vadd.f32 %v2202_v46, %v362_v50  ;;  %v386_v55 = vpop.f32.mrf.mxu3 }
  0xc4   :  { %v436_v56 = vadd.f32 %v2204_v47, %v386_v55  ;;  %v450_v58 = vadd.f32 %v2209_v48, %v430_v53  ;;  %v1117_v53 = vld [vmem:[#allocation8 + $0x8] sm:$0xff] }
  0xc5   :  { %v448_v57 = vadd.f32 %v2209_v48, %v428_v52  ;;  %v1324_v52 = vld [vmem:[#allocation16 + $0x10] sm:$0xff]  ;;  %1182 = vmatpush.msra.mxu1 %v1117_v53 }
  0xc6   :  { %v456_v59 = vadd.f32 %v2209_v48, %v436_v56  ;;  %1339 = vmatpush.msrb.mxu0 %v1324_v52 }
  0xc7   :  { %1482 = vtanh.f32 %v448_v57 }
  0xc8   :  { %1484 = vtanh.f32 %v450_v58  ;;  %1426 = vmatmul.msk.f32.vlgmr.msra.gmra.mxu0 %vm2749_vm0, %v2084_v11  ;;  %v416_v58 = vperm.slane %v408_v51, 0 }
  0xc9   :  { %v371_v63 = vpop.f32.mrf.mxu2  ;;  %1486 = vtanh.f32 %v456_v59  ;;  %1340 = vmatpush.msrb.mxu0 %v1323_v54 }
  0xca   :  { %v365_v62 = vpop.f32.mrf.mxu1  ;;  %v431_v2 = vadd.f32 %v412_v60, %v371_v63 }
  0xcb   :  { %v429_v1 = vadd.f32 %v411_v49, %v365_v62  ;;  %v389_v3 = vpop.f32.mrf.mxu3  ;;  %1341 = vmatpush.msrb.mxu0 %v1322_v16 }
  0xcc   :  { %v451_v6 = vadd.f32 %v2209_v48, %v431_v2  ;;  %v437_v14 = vadd.f32 %v415_v7, %v389_v3 }
  0xcd   :  { %v1483_v4 = vpop.eup %1482  ;;  %v449_v5 = vadd.f32 %v2209_v48, %v429_v1 }
  0xce   :  { %v1485_v8 = vpop.eup %1484  ;;  %v484_v9 = vmul.f32 %v1483_v4, %v2218_v0  ;;  %v457_v25 = vadd.f32 %v2209_v48, %v437_v14 }
  0xcf   :  { %1488 = vtanh.f32 %v449_v5  ;;  %v486_v10 = vmul.f32 %v1485_v8, %v2218_v0  ;;  %v1487_v12 = vpop.eup %1486 }
  0xd0   :  { %v506_v13 = vsel %vm2749_vm0, %v484_v9, 0.0  ;;  %1490 = vtanh.f32 %v451_v6  ;;  %v492_v21 = vmul.f32 %v1487_v12, %v2218_v0 }
  0xd1   :  { %507 = vadd.xlane.f32.xlu2 %v506_v13  ;;  %v512_v15 = vsel %vm2749_vm0, %v486_v10, 0.0  ;;  %v374_v17 = vpop.f32.mrf.mxu2 }
  0xd2   :  { %513 = vadd.xlane.f32.xlu1 %v512_v15  ;;  %v432_v18 = vadd.f32 %v412_v60, %v374_v17  ;;  %v530_v29 = vsel %vm2749_vm0, %v492_v21, 0.0  ;;  %v1116_v15 = vld [vmem:[#allocation8] sm:$0xff] }
  0xd3   :  { %v392_v20 = vpop.f32.mrf.mxu3  ;;  %1183 = vmatpush.msra.mxu1 %v1116_v15 }
  0xd4   :  { %v2231_v22 = vadd.f32 %v415_v7, %v392_v20  ;;  %v452_v24 = vadd.f32 %v2209_v48, %v432_v18 }
  0xd5   :  { %v1489_v23 = vpop.eup %1488 }
  0xd6   :  { %v485_v26 = vmul.f32 %v1489_v23, %v2218_v0  ;;  %v1491_v27 = vpop.eup %1490  ;;  %1492 = vtanh.f32 %v452_v24  ;;  %v458_v39 = vadd.f32 %v2209_v48, %v2231_v22 }
  0xd7   :  { %1494 = vtanh.f32 %v457_v25  ;;  %v487_v34 = vmul.f32 %v1491_v27, %v2218_v0 }
  0xd8   :  { %v509_v30 = vsel %vm2749_vm0, %v485_v26, 0.0 }
  0xd9   :  { %510 = vadd.xlane.f32.xlu2 %v509_v30  ;;  %v377_v33 = vpop.f32.mrf.mxu2  ;;  %v515_v44 = vsel %vm2749_vm0, %v487_v34, 0.0 }
  0xda   :  { %531 = vadd.xlane.f32.xlu1 %v530_v29  ;;  %v433_v38 = vadd.f32 %v413_v28, %v377_v33 }
  0xdb   :  { %v395_v61 = vpop.f32.mrf.mxu3 }
  0xdc   :  { %v1493_v40 = vpop.eup %1492  ;;  %v453_v42 = vadd.f32 %v2209_v48, %v433_v38  ;;  %v439_v62 = vadd.f32 %v416_v58, %v395_v61 }
  0xdd   :  { %v488_v45 = vmul.f32 %v1493_v40, %v2218_v0  ;;  %v1495_v49 = vpop.eup %1494 }
  0xde   :  { %1496 = vtanh.f32 %v453_v42  ;;  %v493_v56 = vmul.f32 %v1495_v49, %v2218_v0  ;;  %v459_v5 = vadd.f32 %v2209_v48, %v439_v62 }
  0xdf   :  { %v518_v50 = vsel %vm2749_vm0, %v488_v45, 0.0 }
  0xe0   :  { %v533_v59 = vsel %vm2749_vm0, %v493_v56, 0.0 }
  0xe1   :  { %516 = vadd.xlane.f32.xlu2 %v515_v44  ;;  %v380_v55 = vpop.f32.mrf.mxu2 }
  0xe2   :  { %519 = vadd.xlane.f32.xlu1 %v518_v50  ;;  %v434_v57 = vadd.f32 %v413_v28, %v380_v55 }
  0xe3   :  { %v398_v18 = vpop.f32.mrf.mxu3 }
  0xe4   :  { %v454_v11 = vadd.f32 %v2209_v48, %v434_v57  ;;  %v1497_v60 = vpop.eup %1496  ;;  %v440_v21 = vadd.f32 %v416_v58, %v398_v18  ;;  %v2308_v58 = vadd.s32 4294967288, %v2182_v35 }
  0xe5   :  { %v489_v1 = vmul.f32 %v1497_v60, %v2218_v0 }
  0xe6   :  { %1498 = vtanh.f32 %v454_v11  ;;  %v460_v25 = vadd.f32 %v2209_v48, %v440_v21 }
  0xe7   :  { %v521_v6 = vsel %vm2749_vm0, %v489_v1, 0.0 }
  0xe9   :  { %534 = vadd.xlane.f32.xlu2 %v533_v59  ;;  %v383_v63 = vpop.f32.mrf.mxu2 }
  0xea   :  { %v435_v2 = vadd.f32 %v2204_v47, %v383_v63 }
  0xec   :  { %v1499_v3 = vpop.eup %1498  ;;  %v455_v4 = vadd.f32 %v2209_v48, %v435_v2 }
  0xed   :  { %v490_v7 = vmul.f32 %v1499_v3, %v2218_v0 }
  0xee   :  { %1500 = vtanh.f32 %v455_v4 }
  0xef   :  { %v524_v8 = vsel %vm2749_vm0, %v490_v7, 0.0  ;;  %1502 = vtanh.f32 %v459_v5 }
  0xf0   :  { %525 = vadd.xlane.f32.xlu1 %v524_v8 }
  0xf1   :  { %522 = vadd.xlane.f32.xlu2 %v521_v6 }
  0xf4   :  { %v1501_v9 = vpop.eup %1500 }
  0xf5   :  { %v491_v10 = vmul.f32 %v1501_v9, %v2218_v0  ;;  %v1503_v12 = vpop.eup %1502 }
  0xf6   :  { %v495_v13 = vmul.f32 %v1503_v12, %v2218_v0 }
  0xf7   :  { %v527_v47 = vsel %vm2749_vm0, %v491_v10, 0.0 }
  0xf8   :  { %v539_v14 = vsel %vm2749_vm0, %v495_v13, 0.0 }
  0xf9   :  { %528 = vadd.xlane.f32.xlu2 %v527_v47 }
 0x101   :  { %540 = vadd.xlane.f32.xlu2 %v539_v14 }
 0x125   :  { %v231_v17 = vpop.f32.mrf.mxu0 }
 0x126   :  { %1425 = vmatmul.msk.f32.vlgmr.msra.gmra.mxu1 %vm2749_vm0, %v231_v17  ;;  %1430 = vmatmul.msk.f32.vlgmr.msrb.gmra.mxu0 %vm2749_vm0, %v231_v17 }
 0x12d   :  { %v353_v20 = vpop.f32.mrf.mxu0 }
 0x12e   :  { %v425_v23 = vadd.f32 %v409_v19, %v353_v20 }
 0x130   :  { %v445_v24 = vadd.f32 %v2209_v48, %v425_v23 }
 0x132   :  { %1504 = vtanh.f32 %v445_v24 }
 0x133   :  { %1506 = vtanh.f32 %v460_v25 }
 0x135   :  { %v356_v26 = vpop.f32.mrf.mxu0 }
 0x136   :  { %v426_v27 = vadd.f32 %v409_v19, %v356_v26 }
 0x138   :  { %v1505_v28 = vpop.eup %1504  ;;  %v446_v29 = vadd.f32 %v2209_v48, %v426_v27 }
 0x139   :  { %v481_v30 = vmul.f32 %v1505_v28, %v2218_v0  ;;  %v1507_v41 = vpop.eup %1506 }
 0x13a   :  { %1508 = vtanh.f32 %v446_v29  ;;  %v496_v34 = vmul.f32 %v1507_v41, %v2218_v0 }
 0x13b   :  { %v497_v31 = vsel %vm2749_vm0, %v481_v30, 0.0 }
 0x13c   :  { %498 = vadd.xlane.f32.xlu0 %v497_v31  ;;  %v542_v40 = vsel %vm2749_vm0, %v496_v34, 0.0 }
 0x13d   :  { %v359_v32 = vpop.f32.mrf.mxu0 }
 0x13e   :  { %v427_v33 = vadd.f32 %v2202_v46, %v359_v32 }
 0x140   :  { %v1509_v36 = vpop.eup %1508  ;;  %v447_v37 = vadd.f32 %v2209_v48, %v427_v33 }
 0x141   :  { %v482_v38 = vmul.f32 %v1509_v36, %v2218_v0 }
 0x142   :  { %1510 = vtanh.f32 %v447_v37 }
 0x143   :  { %v500_v42 = vsel %vm2749_vm0, %v482_v38, 0.0  ;;  %1512 = vtanh.f32 %v458_v39 }
 0x144   :  { %543 = vadd.xlane.f32.xlu0 %v542_v40  ;;  %501 = vadd.xlane.f32.xlu1 %v500_v42  ;;  %v2289_v48 = vpop.xlane.xlu2 %507 }
 0x145   :  { %v2291_v22 = vpop.xlane.xlu1 %513  ;;  %v567_v61 = vperm.slane %v2289_v48, %v2308_v58 }
 0x146   :  { %v570_v1 = vperm.slane %v2291_v22, %v2308_v58 }
 0x148   :  { %v1511_v43 = vpop.eup %1510 }
 0x149   :  { %v483_v46 = vmul.f32 %v1511_v43, %v2218_v0  ;;  %v1513_v45 = vpop.eup %1512 }
 0x14a   :  { %v494_v49 = vmul.f32 %v1513_v45, %v2218_v0 }
 0x14b   :  { %v503_v44 = vsel %vm2749_vm0, %v483_v46, 0.0 }
 0x14c   :  { %504 = vadd.xlane.f32.xlu1 %v503_v44  ;;  %v536_v50 = vsel %vm2749_vm0, %v494_v49, 0.0  ;;  %v2293_v51 = vpop.xlane.xlu2 %510 }
 0x14d   :  { %v2295_v52 = vpop.xlane.xlu1 %531  ;;  %v569_v62 = vperm.slane %v2293_v51, %v2182_v35 }
 0x14e   :  { %v579_v15 = vperm.slane %v2295_v52, %v2308_v58 }
 0x14f   :  { %v571_v10 = vsel %vm564_vm4, %v570_v1, %v569_v62 }
 0x154   :  { %537 = vadd.xlane.f32.xlu1 %v536_v50  ;;  %v2297_v53 = vpop.xlane.xlu2 %516 }
 0x155   :  { %v2299_v54 = vpop.xlane.xlu1 %519  ;;  %v572_v63 = vperm.slane %v2297_v53, %v2182_v35 }
 0x156   :  { %v573_v3 = vperm.slane %v2299_v54, %v2308_v58 }
 0x158   :  { %v574_v47 = vsel %vm564_vm4, %v573_v3, %v572_v63 }
 0x15c   :  { %v2301_v55 = vpop.xlane.xlu2 %534 }
 0x15d   :  { %v581_v24 = vperm.slane %v2301_v55, %v2182_v35 }
 0x163   :  { %v2303_v56 = vpop.xlane.xlu1 %525 }
 0x164   :  { %v2305_v0 = vpop.xlane.xlu2 %522  ;;  %v576_v7 = vperm.slane %v2303_v56, %v2308_v58 }
 0x165   :  { %v575_v6 = vperm.slane %v2305_v0, %v2182_v35 }
 0x167   :  { %v577_v18 = vsel %vm564_vm4, %v576_v7, %v575_v6 }
 0x16c   :  { %v2310_v59 = vpop.xlane.xlu2 %528 }
 0x16d   :  { %v578_v16 = vperm.slane %v2310_v59, %v2182_v35 }
 0x16f   :  { %v580_v26 = vsel %vm564_vm4, %v579_v15, %v578_v16 }
 0x174   :  { %v2343_v19 = vpop.xlane.xlu2 %540 }
 0x175   :  { %v584_v27 = vperm.slane %v2343_v19, %v2182_v35 }
 0x1af   :  { %v499_v11 = vpop.xlane.xlu0 %498 }
 0x1b0   :  { %v561_v4 = vperm.slane %v499_v11, %v2182_v35 }
 0x1b7   :  { %v502_v57 = vpop.xlane.xlu1 %501  ;;  %v2334_v13 = vpop.xlane.xlu0 %543 }
 0x1b8   :  { %v563_v60 = vperm.slane %v502_v57, %v2308_v58  ;;  %v585_v20 = vperm.slane %v2334_v13, %v2308_v58 }
 0x1ba   :  { %v565_v8 = vsel %vm564_vm4, %v563_v60, %v561_v4  ;;  %v586_v30 = vsel %vm564_vm4, %v585_v20, %v584_v27 }
 0x1bf   :  { %v505_v2 = vpop.xlane.xlu1 %504 }
 0x1c0   :  { %v566_v5 = vperm.slane %v505_v2, %v2182_v35 }
 0x1c2   :  { %v568_v9 = vsel %vm564_vm4, %v567_v61, %v566_v5 }
 0x1c3   :  { %v588_v12 = vsel %vm587_vm5, %v568_v9, %v565_v8 }
 0x1c4   :  { %v590_v14 = vsel %vm589_vm6, %v571_v10, %v588_v12 }
 0x1c5   :  { %v592_v17 = vsel %vm591_vm7, %v574_v47, %v590_v14 }
 0x1c6   :  { %v594_v23 = vsel %vm593_vm8, %v577_v18, %v592_v17 }
 0x1c7   :  { %v538_v21 = vpop.xlane.xlu1 %537  ;;  %v596_v29 = vsel %vm595_vm9, %v580_v26, %v594_v23 }
 0x1c8   :  { %v582_v25 = vperm.slane %v538_v21, %v2308_v58 }
 0x1ca   :  { %v583_v28 = vsel %vm564_vm4, %v582_v25, %v581_v24 }
 0x1cb   :  { %v598_v31 = vsel %vm597_vm10, %v583_v28, %v596_v29 }
 0x1cc   :  { %v600_v41 = vsel %vm599_vm11, %v586_v30, %v598_v31 }
 0x1cd   :  { %v603_v32 = vsel %vm2750_vm12, %v600_v41, -inf }
 0x1ce   :  { %604 = vmax.xlane.f32.xlu1 %v603_v32 }
 0x241   :  { %v2360_v33 = vpop.xlane.xlu1 %604 }
 0x242   :  { %v608_v34 = vperm.slane %v2360_v33, 1  ;;  %v607_v36 = vperm.slane %v2360_v33, 0  ;;  %v610_v40 = vperm.slane %v2360_v33, 3  ;;  %v609_v42 = vperm.slane %v2360_v33, 2 }
 0x243   :  { %v613_v3 = vperm.slane %v2360_v33, 6  ;;  %v611_v5 = vperm.slane %v2360_v33, 4  ;;  %v614_v18 = vperm.slane %v2360_v33, 7 }
 0x244   :  { %v625_v37 = vsub.f32 %v505_v2, %v608_v34  ;;  %v624_v38 = vsub.f32 %v502_v57, %v607_v36  ;;  %v623_v39 = vsub.f32 %v499_v11, %v607_v36  ;;  %v630_v45 = vsub.f32 %v2299_v54, %v610_v40 }
 0x245   :  { %v626_v49 = vsub.f32 %v2289_v48, %v608_v34  ;;  %v627_v50 = vsub.f32 %v2293_v51, %v609_v42  ;;  %v612_v57 = vperm.slane %v2360_v33, 5  ;;  %v628_v51 = vsub.f32 %v2291_v22, %v609_v42 }
 0x246   :  { %v643_v43 = vmul.f32 1.442695, %v625_v37  ;;  %v641_v46 = vmul.f32 1.442695, %v624_v38  ;;  %v639_v44 = vmul.f32 1.442695, %v623_v39  ;;  %v629_v54 = vsub.f32 %v2297_v53, %v610_v40 }
 0x247   :  { %v653_v60 = vmul.f32 1.442695, %v630_v45  ;;  %v645_v11 = vmul.f32 1.442695, %v626_v49  ;;  %v647_v62 = vmul.f32 1.442695, %v627_v50  ;;  %v633_v48 = vsub.f32 %v2310_v59, %v612_v57 }
 0x248   :  { %1514 = vpow2.f32 %v643_v43  ;;  %v649_v4 = vmul.f32 1.442695, %v628_v51  ;;  %v651_v7 = vmul.f32 1.442695, %v629_v54  ;;  %v636_v22 = vsub.f32 %v538_v21, %v613_v3 }
 0x249   :  { %1516 = vpow2.f32 %v641_v46  ;;  %v659_v2 = vmul.f32 1.442695, %v633_v48  ;;  %v631_v53 = vsub.f32 %v2305_v0, %v611_v5  ;;  %v632_v9 = vsub.f32 %v2303_v56, %v611_v5 }
 0x24a   :  { %1518 = vpow2.f32 %v639_v44  ;;  %v665_v10 = vmul.f32 1.442695, %v636_v22  ;;  %v634_v0 = vsub.f32 %v2295_v52, %v612_v57  ;;  %v635_v56 = vsub.f32 %v2301_v55, %v613_v3 }
 0x24b   :  { %1520 = vpow2.f32 %v653_v60  ;;  %v655_v12 = vmul.f32 1.442695, %v631_v53  ;;  %v657_v14 = vmul.f32 1.442695, %v632_v9  ;;  %v637_v52 = vsub.f32 %v2343_v19, %v614_v18 }
 0x24c   :  { %1522 = vpow2.f32 %v645_v11  ;;  %v661_v17 = vmul.f32 1.442695, %v634_v0  ;;  %v663_v21 = vmul.f32 1.442695, %v635_v56  ;;  %v638_v55 = vsub.f32 %v2334_v13, %v614_v18 }
 0x24d   :  { %1524 = vpow2.f32 %v647_v62  ;;  %v667_v25 = vmul.f32 1.442695, %v637_v52 }
 0x24e   :  { %v2370_v61 = vpop.eup %1514  ;;  %1526 = vpow2.f32 %v659_v2  ;;  %v669_v26 = vmul.f32 1.442695, %v638_v55 }
 0x24f   :  { %v2372_v63 = vpop.eup %1516  ;;  %694 = vperm.xlu1 %1476, %v2370_v61   ;;  %1528 = vpow2.f32 %v649_v4 }
 0x250   :  { %v2375_v1 = vpop.eup %1518  ;;  %691 = vperm.xlu0 %1474, %v2372_v63   ;;  %1530 = vpow2.f32 %v651_v7 }
 0x251   :  { %688 = vperm.xlu2 %1475, %v2375_v1   ;;  %v2384_v6 = vpop.eup %1520  ;;  %1532 = vpow2.f32 %v665_v10 }
 0x252   :  { %v2386_v8 = vpop.eup %1522  ;;  %1534 = vpow2.f32 %v655_v12 }
 0x253   :  { %v2389_v59 = vpop.eup %1524  ;;  %1536 = vpow2.f32 %v657_v14 }
 0x254   :  { %v2395_v47 = vpop.eup %1526  ;;  %1538 = vpow2.f32 %v661_v17 }
 0x255   :  { %v2397_v15 = vpop.eup %1528  ;;  %1540 = vpow2.f32 %v663_v21 }
 0x256   :  { %v2400_v16 = vpop.eup %1530  ;;  %1542 = vpow2.f32 %v667_v25 }
 0x257   :  { %709 = vperm.xlu1 %1476, %v2384_v6   ;;  %v2407_v20 = vpop.eup %1532  ;;  %1544 = vpow2.f32 %v669_v26 }
 0x258   :  { %697 = vperm.xlu0 %1474, %v2386_v8   ;;  %v2409_v23 = vpop.eup %1534 }
 0x259   :  { %700 = vperm.xlu2 %1475, %v2389_v59   ;;  %v2412_v24 = vpop.eup %1536 }
 0x25a   :  { %v2418_v27 = vpop.eup %1538 }
 0x25b   :  { %v2420_v28 = vpop.eup %1540 }
 0x25c   :  { %v2424_v29 = vpop.eup %1542 }
 0x25d   :  { %v2426_v30 = vpop.eup %1544 }
 0x25f   :  { %718 = vperm.xlu1 %1476, %v2395_v47  }
 0x260   :  { %703 = vperm.xlu0 %1474, %v2397_v15  }
 0x261   :  { %706 = vperm.xlu2 %1475, %v2400_v16  }
 0x267   :  { %727 = vperm.xlu1 %1476, %v2407_v20  }
 0x268   :  { %712 = vperm.xlu0 %1474, %v2409_v23  }
 0x269   :  { %715 = vperm.xlu2 %1475, %v2412_v24  }
 0x270   :  { %721 = vperm.xlu0 %1474, %v2418_v27  }
 0x271   :  { %724 = vperm.xlu2 %1475, %v2420_v28  }
 0x278   :  { %730 = vperm.xlu0 %1474, %v2424_v29  }
 0x279   :  { %733 = vperm.xlu2 %1475, %v2426_v30  }
 0x2ab   :  { %v689_v13 = vpop.permute.xlu2 %688 }
 0x2ac   :  { %v735_v49 = vperm.slane %v689_v13, %v2182_v35 }
 0x2b3   :  { %v701_v19 = vpop.permute.xlu2 %700 }
 0x2b4   :  { %v741_v45 = vperm.slane %v701_v19, %v2182_v35 }
 0x2bb   :  { %v707_v32 = vpop.permute.xlu2 %706 }
 0x2bc   :  { %v744_v3 = vperm.slane %v707_v32, %v2182_v35 }
 0x2c1   :  { %v695_v41 = vpop.permute.xlu1 %694 }
 0x2c2   :  { %v692_v31 = vpop.permute.xlu0 %691  ;;  %v738_v46 = vperm.slane %v695_v41, %v2182_v35 }
 0x2c3   :  { %v716_v37 = vpop.permute.xlu2 %715  ;;  %v736_v44 = vperm.slane %v692_v31, %v2308_v58 }
 0x2c4   :  { %v748_v54 = vperm.slane %v716_v37, %v2308_v58 }
 0x2c5   :  { %v737_v62 = vsel %vm564_vm4, %v736_v44, %v735_v49 }
 0x2c9   :  { %v710_v34 = vpop.permute.xlu1 %709 }
 0x2ca   :  { %v698_v33 = vpop.permute.xlu0 %697  ;;  %v745_v48 = vperm.slane %v710_v34, %v2308_v58 }
 0x2cb   :  { %v739_v40 = vperm.slane %v698_v33, %v2308_v58  ;;  %v725_v42 = vpop.permute.xlu2 %724 }
 0x2cc   :  { %v746_v53 = vsel %vm564_vm4, %v745_v48, %v744_v3  ;;  %v753_v56 = vperm.slane %v725_v42, %v2182_v35 }
 0x2cd   :  { %v740_v50 = vsel %vm564_vm4, %v739_v40, %v738_v46 }
 0x2ce   :  { %v759_v2 = vsel %vm587_vm5, %v740_v50, %v737_v62 }
 0x2d1   :  { %v719_v39 = vpop.permute.xlu1 %718 }
 0x2d2   :  { %v704_v36 = vpop.permute.xlu0 %703  ;;  %v750_v4 = vperm.slane %v719_v39, %v2182_v35 }
 0x2d3   :  { %v742_v43 = vperm.slane %v704_v36, %v2308_v58  ;;  %v734_v10 = vpop.permute.xlu2 %733 }
 0x2d4   :  { %v757_v21 = vperm.slane %v734_v10, %v2308_v58 }
 0x2d5   :  { %v743_v60 = vsel %vm564_vm4, %v742_v43, %v741_v45 }
 0x2d6   :  { %v760_v5 = vsel %vm589_vm6, %v743_v60, %v759_v2 }
 0x2d7   :  { %v761_v14 = vsel %vm591_vm7, %v746_v53, %v760_v5 }
 0x2d9   :  { %v728_v7 = vpop.permute.xlu1 %727 }
 0x2da   :  { %v713_v38 = vpop.permute.xlu0 %712  ;;  %v754_v12 = vperm.slane %v728_v7, %v2308_v58 }
 0x2db   :  { %v747_v57 = vperm.slane %v713_v38, %v2182_v35 }
 0x2dc   :  { %v755_v55 = vsel %vm564_vm4, %v754_v12, %v753_v56 }
 0x2dd   :  { %v749_v22 = vsel %vm564_vm4, %v748_v54, %v747_v57 }
 0x2de   :  { %v762_v0 = vsel %vm593_vm8, %v749_v22, %v761_v14 }
 0x2e2   :  { %v722_v11 = vpop.permute.xlu0 %721 }
 0x2e3   :  { %v751_v51 = vperm.slane %v722_v11, %v2308_v58 }
 0x2e5   :  { %v752_v9 = vsel %vm564_vm4, %v751_v51, %v750_v4 }
 0x2e6   :  { %v763_v18 = vsel %vm595_vm9, %v752_v9, %v762_v0 }
 0x2e7   :  { %v764_v26 = vsel %vm597_vm10, %v755_v55, %v763_v18 }
 0x2ea   :  { %v731_v17 = vpop.permute.xlu0 %730 }
 0x2eb   :  { %v756_v52 = vperm.slane %v731_v17, %v2182_v35 }
 0x2ed   :  { %v758_v25 = vsel %vm564_vm4, %v757_v21, %v756_v52 }
 0x2ee   :  { %v765_v13 = vsel %vm599_vm11, %v758_v25, %v764_v26 }
 0x2ef   :  { %v767_v19 = vsel %vm2750_vm12, %v765_v13, 0.0 }
 0x2f0   :  { %768 = vadd.xlane.f32.xlu1 %v767_v19 }
 0x363   :  { %v2462_v31 = vpop.xlane.xlu1 %768 }
 0x364   :  { %v771_v41 = vperm.slane %v2462_v31, 0  ;;  %v772_v32 = vperm.slane %v2462_v31, 1  ;;  %v2467_v33 = vperm.slane %v2462_v31, 2  ;;  %v776_v34 = vperm.slane %v2462_v31, 5 }
 0x365   :  { %v2472_v37 = vperm.slane %v2462_v31, 3  ;;  %v2480_v62 = vperm.slane %v2462_v31, 4  ;;  %v2499_v26 = vperm.slane %v2462_v31, 6 }
 0x366   :  { %1546 = vrcp.f32 %v771_v41  ;;  %v796_v46 = vand.u32 2147483647, %v771_v41  ;;  %v798_v44 = vand.u32 2147483648, %v771_v41  ;;  %v876_v48 = vand.u32 2147483647, %v776_v34 }
 0x367   :  { %1548 = vrcp.f32 %v772_v32  ;;  %vm792_vm14 = vweird.f32 %v771_v41  ;;  %v878_v2 = vand.u32 2147483648, %v776_v34  ;;  %v814_v10 = vand.u32 2147483648, %v772_v32 }
 0x368   :  { %1550 = vrcp.f32 %v2467_v33  ;;  %vm797_vm2 = vcmp.eq.f32.partialorder %v796_v46, 8.507059e+37  ;;  %v799_v3 = vor.u32 1.1754944e-38, %v798_v44  ;;  %vm808_vm12 = vweird.f32 %v772_v32 }
 0x369   :  { %1552 = vrcp.f32 %v776_v34  ;;  %v812_v0 = vand.u32 2147483647, %v772_v32  ;;  %v879_v18 = vor.u32 1.1754944e-38, %v878_v2  ;;  %v815_v55 = vor.u32 1.1754944e-38, %v814_v10 }
 0x36a   :  { %1554 = vrcp.f32 %v2472_v37 }
 0x36b   :  { %1556 = vrcp.f32 %v2480_v62 }
 0x36c   :  { %v1547_v36 = vpop.eup %1546  ;;  %1558 = vrcp.f32 %v2499_v26 }
 0x36d   :  { %v1549_v38 = vpop.eup %1548  ;;  %v788_v39 = vmul.f32 %v1547_v36, %v771_v41  ;;  %vm793_vm13 = vweird.f32 %v1547_v36 }
 0x36e   :  { %v2474_v40 = vpop.eup %1550  ;;  %v804_v42 = vmul.f32 %v1549_v38, %v772_v32  ;;  %vm794_vm15 = vmor %vm792_vm14, %vm793_vm13  ;;  %vm809_vm3 = vweird.f32 %v1549_v38  ;;  %vm872_vm13 = vweird.f32 %v776_v34 }
 0x36f   :  { %v789_v43 = vsub.f32 1.0, %v788_v39  ;;  %v1553_v49 = vpop.eup %1552  ;;  %v820_v60 = vmul.f32 %v2474_v40, %v2467_v33  ;;  %vm2487_vm14 = vmor %vm808_vm12, %vm809_vm3  ;;  %vm813_vm12 = vcmp.eq.f32.partialorder %v812_v0, 8.507059e+37  ;;  %vm824_vm3 = vweird.f32 %v2467_v33 }
 0x370   :  { %v805_v45 = vsub.f32 1.0, %v804_v42  ;;  %v868_v57 = vmul.f32 %v1553_v49, %v776_v34  ;;  %v2482_v22 = vpop.eup %1554  ;;  %vm873_vm0 = vweird.f32 %v1553_v49  ;;  %v828_v42 = vand.u32 2147483647, %v2467_v33 }
 0x371   :  { %v790_v50 = vmul.f32 %v1547_v36, %v789_v43  ;;  %v821_v7 = vsub.f32 1.0, %v820_v60  ;;  %v1557_v34 = vpop.eup %1556 }
 0x372   :  { %v806_v11 = vmul.f32 %v1549_v38, %v805_v45  ;;  %v869_v54 = vsub.f32 1.0, %v868_v57  ;;  %v852_v46 = vmul.f32 %v1557_v34, %v2480_v62  ;;  %v844_v57 = vand.u32 2147483647, %v2472_v37 }
 0x373   :  { %v791_v51 = vadd.f32 %v1547_v36, %v790_v50  ;;  %v846_v50 = vand.u32 2147483648, %v2472_v37 }
 0x374   :  { %v807_v5 = vadd.f32 %v1549_v38, %v806_v11  ;;  %v870_v53 = vmul.f32 %v1553_v49, %v869_v54 }
 0x375   :  { %v795_v4 = vsel %vm794_vm15, %v1547_v36, %v791_v51  ;;  %vm874_vm15 = vmor %vm872_vm13, %vm873_vm0  ;;  %vm825_vm0 = vweird.f32 %v2474_v40  ;;  %v830_v36 = vand.u32 2147483648, %v2467_v33  ;;  %v853_v33 = vsub.f32 1.0, %v852_v46 }
 0x376   :  { %v800_v9 = vsel %vm797_vm2, %v799_v3, %v795_v4  ;;  %v871_v56 = vadd.f32 %v1553_v49, %v870_v53  ;;  %v811_v21 = vsel %vm2487_vm14, %v1549_v38, %v807_v5  ;;  %vm877_vm2 = vcmp.eq.f32.partialorder %v876_v48, 8.507059e+37  ;;  %vm826_vm13 = vmor %vm824_vm3, %vm825_vm0 }
 0x377   :  { %v802_v12 = vmul.f32 %v2372_v63, %v800_v9  ;;  %v801_v14 = vmul.f32 %v2375_v1, %v800_v9  ;;  %v822_v63 = vmul.f32 %v2474_v40, %v821_v7  ;;  %v836_v1 = vmul.f32 %v2482_v22, %v2472_v37 }
 0x378   :  { %v875_v52 = vsel %vm874_vm15, %v1553_v49, %v871_v56  ;;  %v816_v19 = vsel %vm813_vm12, %v815_v55, %v811_v21  ;;  %v831_v44 = vor.u32 1.1754944e-38, %v830_v36  ;;  %vm829_vm14 = vcmp.eq.f32.partialorder %v828_v42, 8.507059e+37  ;;  %v1559_v49 = vpop.eup %1558  ;;  %v1127_v42 = vld [vmem:[#allocation10 + $0x38] sm:$0xff] }
 0x379   :  { %935 = vperm.xlu2 %1475, %v802_v12   ;;  %932 = vperm.xlu0 %1474, %v801_v14   ;;  %v2496_v25 = vsel %vm877_vm2, %v879_v18, %v875_v52  ;;  %v823_v41 = vadd.f32 %v2474_v40, %v822_v63  ;;  %v837_v32 = vsub.f32 1.0, %v836_v1  ;;  %v818_v38 = vmul.f32 %v2386_v8, %v816_v19 }
 0x37a   :  { %v881_v13 = vmul.f32 %v2395_v47, %v2496_v25  ;;  %v817_v39 = vmul.f32 %v2370_v61, %v816_v19  ;;  %v2515_v8 = vperm.slane %v2462_v31, 7  ;;  %vm841_vm15 = vweird.f32 %v2482_v22  ;;  %1153 = vmatpush.msrb.mxu3 %v1127_v42  ;;  %v1580_v42 = vld [vmem:[%s2757_s13 + $0x58] sm:$0xff] }
 0x37b   :  { %v827_v47 = vsel %vm826_vm13, %v2474_v40, %v823_v41  ;;  %v838_v43 = vmul.f32 %v2482_v22, %v837_v32  ;;  %vm840_vm2 = vweird.f32 %v2472_v37  ;;  %v854_v11 = vmul.f32 %v1557_v34, %v853_v33 }
 0x37c   :  { %962 = vperm.xlu1 %1476, %v881_v13   ;;  %v832_v61 = vsel %vm829_vm14, %v831_v44, %v827_v47  ;;  %1560 = vrcp.f32 %v2515_v8  ;;  %vm842_vm12 = vmor %vm840_vm2, %vm841_vm15  ;;  %v884_v48 = vmul.f32 %v1559_v49, %v2499_v26  ;;  %v847_v51 = vor.u32 1.1754944e-38, %v846_v50  ;;  %v1126_v47 = vld [vmem:[#allocation10 + $0x30] sm:$0xff]  ;;  %v1125_v44 = vld [vmem:[#allocation10 + $0x28] sm:$0xff] }
 0x37d   :  { %v839_v45 = vadd.f32 %v2482_v22, %v838_v43  ;;  %v834_v40 = vmul.f32 %v2397_v15, %v832_v61  ;;  %v833_v60 = vmul.f32 %v2389_v59, %v832_v61  ;;  %vm845_vm0 = vcmp.eq.f32.partialorder %v844_v57, 8.507059e+37  ;;  %1154 = vmatpush.msrb.mxu3 %v1126_v47 }
 0x37e   :  { %v855_v15 = vadd.f32 %v1557_v34, %v854_v11  ;;  %vm857_vm3 = vweird.f32 %v1557_v34  ;;  %v885_v59 = vsub.f32 1.0, %v884_v48  ;;  %v862_v3 = vand.u32 2147483648, %v2480_v62  ;;  %v1572_v11 = vld [vmem:[%s2757_s13 + $0x18] sm:$0xff] }
 0x37f   :  { %v843_v31 = vsel %vm842_vm12, %v2482_v22, %v839_v45  ;;  %vm856_vm13 = vweird.f32 %v2480_v62  ;;  %v860_v5 = vand.u32 2147483647, %v2480_v62  ;;  %vm889_vm2 = vweird.f32 %v1559_v49  ;;  %1155 = vmatpush.msrb.mxu3 %v1125_v44  ;;  %v1570_v45 = vld [vmem:[%s2757_s13 + $0x8] sm:$0xff] }
 0x380   :  { %v848_v54 = vsel %vm845_vm0, %v847_v51, %v843_v31  ;;  %vm858_vm14 = vmor %vm856_vm13, %vm857_vm3  ;;  %v886_v22 = vmul.f32 %v1559_v49, %v885_v59  ;;  %v863_v9 = vor.u32 1.1754944e-38, %v862_v3  ;;  %vm888_vm12 = vweird.f32 %v2499_v26 }
 0x381   :  { %941 = vperm.xlu2 %1475, %v818_v38   ;;  %938 = vperm.xlu0 %1474, %v817_v39   ;;  %v850_v37 = vmul.f32 %v2384_v6, %v848_v54  ;;  %v849_v4 = vmul.f32 %v2400_v16, %v848_v54  ;;  %v859_v7 = vsel %vm858_vm14, %v1557_v34, %v855_v15  ;;  %vm861_vm15 = vcmp.eq.f32.partialorder %v860_v5, 8.507059e+37  ;;  %vm890_vm0 = vmor %vm888_vm12, %vm889_vm2  ;;  %v1568_v34 = vld [vmem:[#allocation2] sm:$0xff] }
 0x382   :  { %v1561_v2 = vpop.eup %1560  ;;  %v864_v10 = vsel %vm861_vm15, %v863_v9, %v859_v7  ;;  %v887_v12 = vadd.f32 %v1559_v49, %v886_v22  ;;  %v894_v6 = vand.u32 2147483648, %v2499_v26  ;;  %v892_v62 = vand.u32 2147483647, %v2499_v26  ;;  %v1575_v7 = vld [vmem:[%s2757_s13 + $0x28] sm:$0xff]  ;;  %v1576_v9 = vld [vmem:[%s2757_s13 + $0x40] sm:$0xff] }
 0x383   :  { %v900_v53 = vmul.f32 %v1561_v2, %v2515_v8  ;;  %v866_v16 = vmul.f32 %v2412_v24, %v864_v10  ;;  %v865_v0 = vmul.f32 %v2409_v23, %v864_v10  ;;  %vm905_vm13 = vweird.f32 %v1561_v2 }
 0x384   :  { %v891_v56 = vsel %vm890_vm0, %v1559_v49, %v887_v12  ;;  %v895_v18 = vor.u32 1.1754944e-38, %v894_v6  ;;  %vm893_vm3 = vcmp.eq.f32.partialorder %v892_v62, 8.507059e+37  ;;  %v910_v1 = vand.u32 2147483648, %v2515_v8  ;;  %v1571_v49 = vld [vmem:[%s2757_s13 + $0x10] sm:$0xff]  ;;  %v1122_v12 = vld [vmem:[#allocation10 + $0x10] sm:$0xff] }
 0x385   :  { %v901_v14 = vsub.f32 1.0, %v900_v53  ;;  %v882_v23 = vmul.f32 %v2418_v27, %v2496_v25  ;;  %vm904_vm14 = vweird.f32 %v2515_v8  ;;  %v908_v52 = vand.u32 2147483647, %v2515_v8  ;;  %v1479_v27 = vld [vmem:[%s2739_s12] ss:$0 sm:$0xff]  ;;  %v1218_v25 = vpop.f32.mrf.mxu0 }
 0x386   :  { %v896_v21 = vsel %vm893_vm3, %v895_v18, %v891_v56  ;;  %vm906_vm15 = vmor %vm904_vm14, %vm905_vm13  ;;  %v911_v26 = vor.u32 1.1754944e-38, %v910_v1  ;;  %v2550_v32 = vadd.f32 %v1479_v27, %v1218_v25  ;;  %v1569_v8 = vld [vmem:[%s2757_s13] sm:$0xff]  ;;  %v1121_v56 = vld [vmem:[#allocation10 + $0x8] sm:$0xff]  ;;  %vm2761_vm12 = vcmask 130048  }
 0x387   :  { %v902_v17 = vmul.f32 %v1561_v2, %v901_v14  ;;  %v897_v24 = vmul.f32 %v2420_v28, %v896_v21  ;;  %vm909_vm2 = vcmp.eq.f32.partialorder %v908_v52, 8.507059e+37  ;;  %v898_v41 = vmul.f32 %v2407_v20, %v896_v21  ;;  %v1279_v14 = vld [vmem:[#allocation14 + $0x38] sm:$0xff]  ;;  %v1278_v6 = vld [vmem:[#allocation14 + $0x30] sm:$0xff]  ;;  %v1277_v1 = vld [vmem:[#allocation14 + $0x28] sm:$0xff] }
 0x388   :  { %1288 = vmatpush.msrb.mxu1 %v1279_v14  ;;  %v1578_v18 = vld [vmem:[%s2757_s13 + $0x48] sm:$0xff] }
 0x389   :  { %947 = vperm.xlu2 %1475, %v834_v40   ;;  %944 = vperm.xlu0 %1474, %v833_v60   ;;  %v903_v63 = vadd.f32 %v1561_v2, %v902_v17  ;;  %v1124_v40 = vld [vmem:[#allocation10 + $0x20] sm:$0xff]  ;;  %v1123_v60 = vld [vmem:[#allocation10 + $0x18] sm:$0xff] }
 0x38a   :  { %1156 = vmatpush.msrb.mxu3 %v1124_v40  ;;  %1289 = vmatpush.msrb.mxu1 %v1278_v6 }
 0x38b   :  { %v907_v55 = vsel %vm906_vm15, %v1561_v2, %v903_v63  ;;  %v1573_v2 = vld [vmem:[%s2757_s13 + $0x20] sm:$0xff] }
 0x38c   :  { %v912_v13 = vsel %vm909_vm2, %v911_v26, %v907_v55  ;;  %1157 = vmatpush.msrb.mxu3 %v1123_v60  ;;  %1290 = vmatpush.msrb.mxu1 %v1277_v1 }
 0x38d   :  { %v913_v19 = vmul.f32 %v2424_v29, %v912_v13  ;;  %v914_v28 = vmul.f32 %v2426_v30, %v912_v13 }
 0x38e   :  { %1158 = vmatpush.msrb.mxu3 %v1122_v12  ;;  %v1272_v12 = vld [vmem:[#allocation14] sm:$0xff] }
 0x390   :  { %1159 = vmatpush.msrb.mxu3 %v1121_v56 }
 0x391   :  { %953 = vperm.xlu2 %1475, %v850_v37   ;;  %950 = vperm.xlu0 %1474, %v849_v4   ;;  %v1574_v37 = vld [vmem:[%s2757_s13 + $0x30] sm:$0xff] }
 0x399   :  { %959 = vperm.xlu2 %1475, %v866_v16   ;;  %956 = vperm.xlu0 %1474, %v865_v0   ;;  %v1577_v16 = vld [vmem:[%s2757_s13 + $0x38] sm:$0xff] }
 0x3a1   :  { %968 = vperm.xlu2 %1475, %v897_v24   ;;  %965 = vperm.xlu0 %1474, %v882_v23   ;;  %v1120_v24 = vld [vmem:[#allocation10] sm:$0xff] }
 0x3a2   :  { %v1579_v23 = vld [vmem:[%s2757_s13 + $0x50] sm:$0xff]  ;;  %1160 = vmatpush.msrb.mxu3 %v1120_v24 }
 0x3a9   :  { %974 = vperm.xlu2 %1475, %v913_v19   ;;  %971 = vperm.xlu0 %1474, %v898_v41   ;;  %v1276_v41 = vld [vmem:[#allocation14 + $0x20] sm:$0xff] }
 0x3aa   :  { %1291 = vmatpush.msrb.mxu1 %v1276_v41 }
 0x3b1   :  { %977 = vperm.xlu0 %1474, %v914_v28   ;;  %1242 = vrot.lane.b32.xlu2 %v2550_v32, %s1900_s4 }
 0x3b9   :  { %1258 = vrot.lane.b32.xlu2 %v1568_v34, %s1901_s28 }
 0x3d3   :  { %v2554_v20 = vpop.permute.xlu2 %935 }
 0x3d4   :  { %v1029_v33 = vmul.f32 %v1570_v45, %v2554_v20 }
 0x3d6   :  { %v1045_v54 = vsel %vm287_vm1, %v1029_v33, 0.0  ;;  %v1275_v33 = vld [vmem:[#allocation14 + $0x18] sm:$0xff] }
 0x3d7   :  { %1292 = vmatpush.msrb.mxu1 %v1275_v33 }
 0x3db   :  { %v2558_v36 = vpop.permute.xlu2 %941 }
 0x3dc   :  { %v1031_v48 = vmul.f32 %v1572_v11, %v2558_v36  ;;  %v1274_v11 = vld [vmem:[#allocation14 + $0x10] sm:$0xff] }
 0x3dd   :  { %1293 = vmatpush.msrb.mxu1 %v1274_v11 }
 0x3de   :  { %v1054_v5 = vsel %vm287_vm1, %v1031_v48, 0.0  ;;  %v980_v48 = vperm.slane %v2554_v20, %v2308_v58  ;;  %v1581_v20 = vld [vmem:[%s2757_s13 + $0x60] sm:$0xff] }
 0x3e3   :  { %v2562_v30 = vpop.permute.xlu2 %947 }
 0x3e4   :  { %v1033_v22 = vmul.f32 %v1575_v7, %v2562_v30 }
 0x3e6   :  { %v1063_v26 = vsel %vm287_vm1, %v1033_v22, 0.0 }
 0x3eb   :  { %v2556_v29 = vpop.permute.xlu0 %932  ;;  %v2566_v43 = vpop.permute.xlu2 %953 }
 0x3ec   :  { %v1028_v61 = vmul.f32 %v1569_v8, %v2556_v29  ;;  %v1035_v0 = vmul.f32 %v1577_v16, %v2566_v43  ;;  %v979_v44 = vperm.slane %v2556_v29, %v2182_v35  ;;  %v983_v29 = vperm.slane %v2558_v36, %v2308_v58 }
 0x3ee   :  { %v1044_v57 = vsel %vm287_vm1, %v1028_v61, 0.0  ;;  %v2606_v53 = vpop.permute.xlu1 %962  ;;  %v1072_v27 = vsel %vm287_vm1, %v1035_v0, 0.0  ;;  %v1582_v0 = vld [vmem:[%s2757_s13 + $0x68] sm:$0xff] }
 0x3ef   :  { %v1046_v15 = vadd.f32 %v1045_v54, %v1044_v57  ;;  %v1038_v52 = vmul.f32 %v1579_v23, %v2606_v53 }
 0x3f1   :  { %v1047_v17 = vrot.slane %v1046_v15, 4 }
 0x3f3   :  { %v2560_v38 = vpop.permute.xlu0 %938  ;;  %v2583_v31 = vpop.permute.xlu2 %959  ;;  %v1048_v8 = vadd.f32 %v1047_v17, %v1046_v15 }
 0x3f4   :  { %v1030_v50 = vmul.f32 %v1571_v49, %v2560_v38  ;;  %v1037_v21 = vmul.f32 %v1578_v18, %v2583_v31  ;;  %v1089_v49 = vsel %vm287_vm1, %v1038_v52, 0.0 }
 0x3f6   :  { %v1053_v59 = vsel %vm287_vm1, %v1030_v50, 0.0  ;;  %v1081_v61 = vsel %vm287_vm1, %v1037_v21, 0.0  ;;  %v982_v50 = vperm.slane %v2560_v38, %v2182_v35  ;;  %v989_v38 = vperm.slane %v2566_v43, %v2308_v58 }
 0x3f7   :  { %v1055_v62 = vadd.f32 %v1054_v5, %v1053_v59  ;;  %v986_v59 = vperm.slane %v2562_v30, %v2308_v58  ;;  %v994_v30 = vperm.slane %v2606_v53, %v2182_v35  ;;  %v992_v43 = vperm.slane %v2583_v31, %v2308_v58 }
 0x3f8   :  { %v984_v5 = vsel %vm564_vm4, %v983_v29, %v982_v50 }
 0x3f9   :  { %v1056_v28 = vrot.slane %v1055_v62, 4 }
 0x3fb   :  { %v2564_v39 = vpop.permute.xlu0 %944  ;;  %v2631_v25 = vpop.permute.xlu2 %968  ;;  %v1057_v54 = vadd.f32 %v1056_v28, %v1055_v62 }
 0x3fc   :  { %v1032_v3 = vmul.f32 %v1573_v2, %v2564_v39  ;;  %v1049_v2 = vrot.slane %v1048_v8, 2  ;;  %v1040_v36 = vmul.f32 %v1581_v20, %v2631_v25  ;;  %v985_v22 = vperm.slane %v2564_v39, %v2182_v35 }
 0x3fd   :  { %v1058_v14 = vrot.slane %v1057_v54, 2 }
 0x3fe   :  { %v1062_v63 = vsel %vm287_vm1, %v1032_v3, 0.0  ;;  %v1050_v53 = vadd.f32 %v1049_v2, %v1048_v8  ;;  %v1098_v17 = vsel %vm287_vm1, %v1040_v36, 0.0  ;;  %v987_v1 = vsel %vm564_vm4, %v986_v59, %v985_v22 }
 0x3ff   :  { %v1064_v34 = vadd.f32 %v1063_v26, %v1062_v63 }
 0x400   :  { %v1051_v36 = vrot.slane %v1050_v53, 1 }
 0x401   :  { %v1065_v15 = vrot.slane %v1064_v34, 4 }
 0x403   :  { %v2568_v46 = vpop.permute.xlu0 %950  ;;  %v1066_v6 = vadd.f32 %v1065_v15, %v1064_v34  ;;  %v975_v18 = vpop.permute.xlu2 %974 }
 0x404   :  { %v1034_v4 = vmul.f32 %v1574_v37, %v2568_v46  ;;  %v1273_v37 = vld [vmem:[#allocation14 + $0x8] sm:$0xff]  ;;  %v988_v16 = vperm.slane %v2568_v46, %v2182_v35 }
 0x405   :  { %1294 = vmatpush.msrb.mxu1 %v1273_v37  ;;  %v1067_v26 = vrot.slane %v1066_v6, 2 }
 0x406   :  { %v1071_v55 = vsel %vm287_vm1, %v1034_v4, 0.0  ;;  %v981_v4 = vsel %vm564_vm4, %v980_v48, %v979_v44 }
 0x407   :  { %v1073_v45 = vadd.f32 %v1072_v27, %v1071_v55  ;;  %v1003_v31 = vsel %vm587_vm5, %v984_v5, %v981_v4  ;;  %1295 = vmatpush.msrb.mxu1 %v1272_v12  ;;  %v1059_v55 = vadd.f32 %v1058_v14, %v1057_v54  ;;  %v1068_v50 = vadd.f32 %v1067_v26, %v1066_v6 }
 0x408   :  { %v1052_v6 = vadd.f32 %v1051_v36, %v1050_v53  ;;  %v1343_v36 = vpop.f32.mrf.mxu0 }
 0x409   :  { %v1074_v3 = vrot.slane %v1073_v45, 4  ;;  %v1069_v5 = vrot.slane %v1068_v50, 1 }
 0x40b   :  { %v2589_v51 = vpop.permute.xlu0 %956  ;;  %v1075_v56 = vadd.f32 %v1074_v3, %v1073_v45  ;;  %v1060_v3 = vrot.slane %v1059_v55, 1  ;;  %v1070_v12 = vadd.f32 %v1069_v5, %v1068_v50 }
 0x40c   :  { %v1036_v10 = vmul.f32 %v1576_v9, %v2589_v51  ;;  %v991_v39 = vperm.slane %v2589_v51, %v2182_v35  ;;  %v997_v51 = vperm.slane %v2631_v25, %v2182_v35 }
 0x40d   :  { %v1076_v27 = vrot.slane %v1075_v56, 2  ;;  %v1061_v22 = vadd.f32 %v1060_v3, %v1059_v55  ;;  %v1185_v55 = vpop.f32.mrf.mxu1 }
 0x40e   :  { %v1080_v13 = vsel %vm287_vm1, %v1036_v10, 0.0  ;;  %v993_v28 = vsel %vm564_vm4, %v992_v43, %v991_v39 }
 0x40f   :  { %v1082_v40 = vadd.f32 %v1081_v61, %v1080_v13  ;;  %v990_v13 = vsel %vm564_vm4, %v989_v38, %v988_v16  ;;  %v1077_v48 = vadd.f32 %v1076_v27, %v1075_v56 }
 0x411   :  { %v1083_v7 = vrot.slane %v1082_v40, 4 }
 0x413   :  { %v2628_v19 = vpop.permute.xlu0 %965  ;;  %v1084_v21 = vadd.f32 %v1083_v7, %v1082_v40  ;;  %v1078_v7 = vrot.slane %v1077_v48, 1 }
 0x414   :  { %v1039_v47 = vmul.f32 %v1580_v42, %v2628_v19  ;;  %v995_v46 = vperm.slane %v2628_v19, %v2308_v58  ;;  %v1583_v19 = vld [vmem:[%s2757_s13 + $0x70] sm:$0xff]  ;;  %v1004_v42 = vsel %vm589_vm6, %v987_v1, %v1003_v31  ;;  %v1136_v31 = vsel %vm587_vm5, %v1061_v22, %v1052_v6 }
 0x415   :  { %v1042_v41 = vmul.f32 %v1583_v19, %v975_v18  ;;  %v1085_v44 = vrot.slane %v1084_v21, 2  ;;  %v1005_v25 = vsel %vm591_vm7, %v990_v13, %v1004_v42  ;;  %v1079_v16 = vadd.f32 %v1078_v7, %v1077_v48  ;;  %v1269_v48 = vld [vmem:[#allocation13 + $0x8] sm:$0xff] }
 0x416   :  { %v1090_v60 = vsel %vm287_vm1, %v1039_v47, 0.0  ;;  %v1000_v47 = vperm.slane %v975_v18, %v2182_v35  ;;  %v996_v8 = vsel %vm564_vm4, %v995_v46, %v994_v30  ;;  %v1006_v40 = vsel %vm593_vm8, %v993_v28, %v1005_v25 }
 0x417   :  { %v1091_v57 = vadd.f32 %v1090_v60, %v1089_v49  ;;  %v1107_v11 = vsel %vm287_vm1, %v1042_v41, 0.0  ;;  %v1007_v29 = vsel %vm595_vm9, %v996_v8, %v1006_v40  ;;  %v1086_v15 = vadd.f32 %v1085_v44, %v1084_v21 }
 0x418   :  { %v1137_v18 = vsel %vm589_vm6, %v1070_v12, %v1136_v31 }
 0x419   :  { %v1092_v9 = vrot.slane %v1091_v57, 4  ;;  %v1087_v43 = vrot.slane %v1086_v15, 1  ;;  %v1138_v46 = vsel %vm591_vm7, %v1079_v16, %v1137_v18  ;;  %vm2762_vm7 = vcmask 261120  }
 0x41b   :  { %v972_v10 = vpop.permute.xlu0 %971  ;;  %v1093_v24 = vadd.f32 %v1092_v9, %v1091_v57  ;;  %v1584_v57 = vld [vmem:[%s2757_s13 + $0x78] sm:$0xff]  ;;  %s1902_s13 = smov 96  }
 0x41c   :  { %v1041_v62 = vmul.f32 %v1582_v0, %v972_v10  ;;  %v998_v23 = vperm.slane %v972_v10, %v2308_v58 }
 0x41d   :  { %v1094_v61 = vrot.slane %v1093_v24, 2 }
 0x41e   :  { %v1099_v63 = vsel %vm287_vm1, %v1041_v62, 0.0  ;;  %v999_v45 = vsel %vm564_vm4, %v998_v23, %v997_v51  ;;  %v1088_v62 = vadd.f32 %v1087_v43, %v1086_v15 }
 0x41f   :  { %v1100_v52 = vadd.f32 %v1099_v63, %v1098_v17  ;;  %v1008_v59 = vsel %vm597_vm10, %v999_v45, %v1007_v29  ;;  %v1268_v29 = vld [vmem:[#allocation13] sm:$0xff] }
 0x420   :  { %v1139_v63 = vsel %vm593_vm8, %v1088_v62, %v1138_v46  ;;  %vm2763_vm8 = vmmov %vm2762_vm7 }
 0x421   :  { %v1101_v34 = vrot.slane %v1100_v52, 4 }
 0x423   :  { %v1102_v33 = vadd.f32 %v1101_v34, %v1100_v52  ;;  %v978_v49 = vpop.permute.xlu0 %977  ;;  %v1480_v52 = vld [vmem:[#allocation11] ss:$0 sm:$0xff] }
 0x424   :  { %v1001_v60 = vperm.slane %v978_v49, %v2308_v58  ;;  %v1043_v35 = vmul.f32 %v1584_v57, %v978_v49  ;;  %v1095_v58 = vadd.f32 %v1094_v61, %v1093_v24  ;;  %v1243_v49 = vpop.permute.xlu2 %1242 }
 0x425   :  { %v1103_v54 = vrot.slane %v1102_v33, 2 }
 0x426   :  { %v1002_v38 = vsel %vm564_vm4, %v1001_v60, %v1000_v47  ;;  %v1108_v2 = vsel %vm287_vm1, %v1043_v35, 0.0  ;;  %v1096_v9 = vrot.slane %v1095_v58, 1  ;;  %v1271_v35 = vld [vmem:[#allocation13 + $0x18] sm:$0xff] }
 0x427   :  { %v1109_v37 = vadd.f32 %v1108_v2, %v1107_v11  ;;  %v1009_v4 = vsel %vm599_vm11, %v1002_v38, %v1008_v59  ;;  %v1104_v20 = vadd.f32 %v1103_v54, %v1102_v33  ;;  %v1270_v11 = vld [vmem:[#allocation13 + $0x10] sm:$0xff]  ;;  %1314 = vmatpush.msra.mxu3 %v1271_v35 }
 0x428   :  { %1011 = vst.msk [vmem:[#allocation20] sm:$0xff] %vm2761_vm12, %v1009_v4  ;;  %v1097_v56 = vadd.f32 %v1096_v9, %v1095_v58 }
 0x429   :  { %v1110_v30 = vrot.slane %v1109_v37, 4  ;;  %v1105_v14 = vrot.slane %v1104_v20, 1  ;;  %1315 = vmatpush.msra.mxu3 %v1270_v11 }
 0x42a   :  { %v1140_v24 = vsel %vm595_vm9, %v1097_v56, %v1139_v63 }
 0x42b   :  { %v1111_v10 = vadd.f32 %v1110_v30, %v1109_v37  ;;  %v1106_v17 = vadd.f32 %v1105_v14, %v1104_v20  ;;  %1316 = vmatpush.msra.mxu3 %v1269_v48  ;;  %v1481_v20 = vld [vmem:[%s2743_s16] ss:$0 sm:$0xff] }
 0x42c   :  { %v1259_v54 = vpop.permute.xlu2 %1258 }
 0x42d   :  { %v1112_v0 = vrot.slane %v1111_v10, 2  ;;  %v1141_v53 = vsel %vm597_vm10, %v1106_v17, %v1140_v24  ;;  %1317 = vmatpush.msra.mxu3 %v1268_v29 }
 0x42f   :  { %v1113_v39 = vadd.f32 %v1112_v0, %v1111_v10 }
 0x431   :  { %v1114_v21 = vrot.slane %v1113_v39, 1 }
 0x433   :  { %v1115_v1 = vadd.f32 %v1114_v21, %v1113_v39 }
 0x435   :  { %v1142_v23 = vsel %vm599_vm11, %v1115_v1, %v1141_v53 }
 0x436   :  { %1424 = vmatmul.msk.f32.vlgmr.msrb.gmra.mxu3 %vm287_vm1, %v1142_v23  ;;  %1428 = vmatmul.msk.f32.vlgmr.msrb.gmra.mxu1 %vm287_vm1, %v1142_v23 }
 0x4b3   :  { %v1297_v37 = vpop.f32.mrf.mxu1 }
 0x4b9   :  { %v1162_v51 = vpop.f32.mrf.mxu3 }
 0x4ba   :  { %v1186_v26 = vadd.f32 %v1185_v55, %v1162_v51 }
 0x4bc   :  { %v1192_v13 = vadd.f32 %v1480_v52, %v1186_v26 }
 0x4be   :  { %v1221_v19 = vadd.f32 %v2550_v32, %v1192_v13 }
 0x4c0   :  { %v1427_v41 = vmul.f32 -1.442695, %v1221_v19 }
 0x4c2   :  { %1562 = vpow2.f32 %v1427_v41 }
 0x4c8   :  { %v1563_v27 = vpop.eup %1562 }
 0x4c9   :  { %v1225_v28 = vadd.f32 1.0, %v1563_v27 }
 0x4cb   :  { %1564 = vrcp.f32 %v1225_v28  ;;  %v1237_v44 = vand.u32 2147483648, %v1225_v28  ;;  %v1235_v25 = vand.u32 2147483647, %v1225_v28  ;;  %vm1231_vm1 = vweird.f32 %v1225_v28 }
 0x4cd   :  { %v1238_v45 = vor.u32 1.1754944e-38, %v1237_v44  ;;  %vm1236_vm6 = vcmp.eq.f32.partialorder %v1235_v25, 8.507059e+37 }
 0x4d1   :  { %v1565_v34 = vpop.eup %1564 }
 0x4d2   :  { %v1227_v42 = vmul.f32 %v1565_v34, %v1225_v28  ;;  %vm1232_vm4 = vweird.f32 %v1565_v34 }
 0x4d3   :  { %vm1233_vm5 = vmor %vm1231_vm1, %vm1232_vm4 }
 0x4d4   :  { %v1228_v47 = vsub.f32 1.0, %v1227_v42 }
 0x4d6   :  { %v1229_v8 = vmul.f32 %v1565_v34, %v1228_v47 }
 0x4d8   :  { %v1230_v61 = vadd.f32 %v1565_v34, %v1229_v8 }
 0x4da   :  { %v1234_v33 = vsel %vm1233_vm5, %v1565_v34, %v1230_v61 }
 0x4db   :  { %v1239_v32 = vsel %vm1236_vm6, %v1238_v45, %v1234_v33 }
 0x4dc   :  { %v1245_v50 = vmul.f32 %v1243_v49, %v1239_v32  ;;  %v1252_v15 = vsub.f32 1.0, %v1239_v32  ;;  %v1261_v38 = vmul.f32 %v1259_v54, %v1239_v32 }
 0x4de   :  { %1247 = vrot.lane.b32.xlu1 %v1245_v50, %s1900_s4 }
 0x550   :  { %v1248_v40 = vpop.permute.xlu1 %1247 }
 0x551   :  { %v1250_v60 = vadd.f32 %v1248_v40, %v1192_v13 }
 0x553   :  { %1566 = vtanh.f32 %v1250_v60 }
 0x559   :  { %v1567_v57 = vpop.eup %1566 }
 0x55a   :  { %1254 = vrot.lane.b32.xlu0 %v1567_v57, %s1902_s13 }
 0x5cc   :  { %v1255_v59 = vpop.permute.xlu0 %1254 }
 0x5cd   :  { %v1257_v2 = vmul.f32 %v1255_v59, %v1252_v15 }
 0x5cf   :  { %v1262_v3 = vadd.f32 %v1261_v38, %v1257_v2 }
 0x5d1   :  { %1264 = vrot.lane.b32.xlu1 %v1262_v3, %s1902_s13 }
 0x643   :  { %v1265_v58 = vpop.permute.xlu1 %1264 }
 0x644   :  { %1267 = vst.msk [vmem:[#allocation18] sm:$0xff] %vm2762_vm7, %v1265_v58  ;;  %1429 = vmatmul.msk.f32.vlgmr.msra.gmra.mxu3 %vm2763_vm8, %v1265_v58 }
 0x645   :  { %1374 = dma.vmem_to_hbm [thread:$0]  %s1370_s2, 128, %s1372_s22, [#allocation19]  }
 0x646   :  { %1385 = dma.vmem_to_hbm [thread:$0]  %s1381_s9, 128, %s1383_s23, [#allocation19]  }
 0x6c7   :  { %v1319_v4 = vpop.f32.mrf.mxu3 }
 0x6c8   :  { %v1320_v5 = vadd.f32 %v1319_v4, %v1297_v37 }
 0x6ca   :  { %v1346_v7 = vadd.f32 %v1343_v36, %v1320_v5 }
 0x6cc   :  { %v1351_v30 = vadd.f32 %v1481_v20, %v1346_v7 }
 0x6ce   :  { %1352 = vst [vmem:[#allocation17] sm:$0xff] %v1351_v30 }
 0x6cf   :  { %1363 = dma.vmem_to_hbm [thread:$0]  %s1359_s5, 128, %s1361_s24, [#allocation4]  }
 0x6d0   :  { %1883 = dma.done.wait [#allocation4], 128  }
 0x6d1   :  { %1884 = vsyncadd [#allocation4], 4294967168 }
 0x6d2   :  { %1885 = dma.done.wait [#allocation19], 256  }
 0x6d3   :  { %1886 = vsyncadd [#allocation19], 4294967040 }
 0x6d4   :  { %1398 = vsyncpa [#allocation3], 1 }
 0x6d5   :  { %1399 = vsyncpa [#allocation6], 1 }
 0x6d6   :  { %1400 = vsyncpa [#allocation9], 1 }
 0x6d7   :  { %1401 = vsyncpa [#allocation12], 1 }
 0x6d8   :  { %1402 = vsyncpa [#allocation15], 1 }
 0x6d9   :  { %1403 = vsyncpa [#allocation4], 1 }
 0x6da   :  { %1404 = vsyncpa [#allocation19], 1 }

</bundles_post_ra>
